<compile_context>
chip_gen: v7x
topology: tpu7x:2x2x1
jax: 0.10.0
libtpu: 0.0.40
codegen_flags: <defaults>
</compile_context>

<pallas_src>
import functools

import jax
import jax.numpy as jnp
from jax.experimental import pallas as pl
from jax.experimental.pallas import tpu as pltpu


def _round_up(n, m):
    return ((n + m - 1) // m) * m


def _pad_axis(a, axis, new_size):
    pad = new_size - a.shape[axis]
    if pad == 0:
        return a
    widths = [(0, 0)] * a.ndim
    widths[axis] = (0, pad)
    return jnp.pad(a, widths)


def _cnn_text_kernel(x_ref, w_all_ref, b_all_ref, wfc_ref, bfc_ref, out_ref,
                     *, Ks, Co):
    tile_n, L, D = x_ref.shape

    # ---- one big MXU matmul covering all branches x all K offsets -----------
    x2 = x_ref[...].reshape(tile_n * L, D)                   # bf16 (tile_n*L, D)
    y = jnp.dot(x2, w_all_ref[...],
                preferred_element_type=jnp.float32)          # (tile_n*L, sum(Ks)*Co) f32
    y = y.reshape(tile_n, L, sum(Ks) * Co)

    acc = jnp.zeros(out_ref.shape, jnp.float32)              # (tile_n, C_pad)
    off = 0
    for bi, K in enumerate(Ks):
        T = L - K + 1
        # conv output = sum of K sublane-shifted, lane-aligned slices of y
        s = y[:, 0:T, off:off + Co]
        for k in range(1, K):
            c0 = off + k * Co
            s = s + y[:, k:k + T, c0:c0 + Co]
        off += K * Co

        # max-pool over time first; bias + ReLU after the pool (equivalent).
        pooled = jnp.max(s, axis=1)                          # (tile_n, Co)
        feat = jnp.maximum(pooled + b_all_ref[bi:bi + 1, :], 0.0)

        # partial fc matmul (avoids concatenating pooled features)
        w_fc = wfc_ref[bi * Co:(bi + 1) * Co, :].astype(jnp.float32)
        acc = acc + jnp.dot(feat, w_fc, preferred_element_type=jnp.float32)

    # TODO(synk): nn.Dropout(0.5) is identity in eval mode; training-mode RNG mask not implemented.
    out_ref[...] = acc + bfc_ref[...]


def cnn_text_forward(x, params, Ks=(3, 4, 5), tile_n=8):
    """Fused CNN_Text forward.

    x: (N, L, D) float32 — the zero-padded embedding tensor.
    params: PyTorch-layout weights, see init_params.
    """
    N, L, D = x.shape
    Co = params[f'b{Ks[0]}'].shape[-1]
    C = params['fc_b'].shape[-1]

    # ---- pad lane dims to multiples of 128, batch to a multiple of tile_n ----
    D_p, Co_p, C_p = _round_up(D, 128), _round_up(Co, 128), _round_up(C, 128)
    N_p = _round_up(N, tile_n)

    x_p = _pad_axis(_pad_axis(x, 2, D_p), 0, N_p).astype(jnp.bfloat16)

    w_cols, b_rows = [], []
    for K in Ks:
        w = _pad_axis(_pad_axis(params[f'w{K}'], 1, D_p), 2, Co_p)   # (K, D_p, Co_p)
        w_cols.append(jnp.transpose(w, (1, 0, 2)).reshape(D_p, K * Co_p))
        b_rows.append(_pad_axis(params[f'b{K}'], 1, Co_p))           # (1, Co_p)
    w_all = jnp.concatenate(w_cols, axis=1).astype(jnp.bfloat16)     # (D_p, sum(Ks)*Co_p)
    b_all = jnp.concatenate(b_rows, axis=0).astype(jnp.float32)      # (len(Ks), Co_p)

    wfc = params['fc_w'].reshape(len(Ks), Co, C)
    wfc = _pad_axis(_pad_axis(wfc, 1, Co_p), 2, C_p)
    wfc = wfc.reshape(len(Ks) * Co_p, C_p).astype(jnp.bfloat16)      # (len(Ks)*Co_p, C_p)
    bfc = _pad_axis(params['fc_b'], 1, C_p).astype(jnp.float32)      # (1, C_p)

    total_co = sum(Ks) * Co_p
    kernel = functools.partial(_cnn_text_kernel, Ks=tuple(Ks), Co=Co_p)

    # NOTE: for production batch sizes pick tile_n against the VMEM budget
    # (2x double-buffered x tile + (tile_n*L, sum(Ks)*Co) f32 intermediate +
    #  resident weights); halve it for v7x's 64 MiB VMEM.
    out = pl.pallas_call(
        kernel,
        out_shape=jax.ShapeDtypeStruct((N_p, C_p), jnp.float32),
        grid_spec=pltpu.PrefetchScalarGridSpec(
            num_scalar_prefetch=0,
            grid=(N_p // tile_n,),
            in_specs=[
                pl.BlockSpec((tile_n, L, D_p), lambda i: (i, 0, 0)),
                pl.BlockSpec((D_p, total_co), lambda i: (0, 0)),
                pl.BlockSpec((len(Ks), Co_p), lambda i: (0, 0)),
                pl.BlockSpec((len(Ks) * Co_p, C_p), lambda i: (0, 0)),
                pl.BlockSpec((1, C_p), lambda i: (0, 0)),
            ],
            out_specs=pl.BlockSpec((tile_n, C_p), lambda i: (i, 0)),
        ),
        compiler_params=pltpu.CompilerParams(
            dimension_semantics=("parallel",)),
    )(x_p, w_all, b_all, wfc, bfc)

    return out[:N, :C]


def ref_forward(x, params, Ks=(3, 4, 5)):
    """Pure-JAX reference mirroring the PyTorch forward (and the kernel's bf16 casts)."""
    xb = x.astype(jnp.bfloat16)
    feats = []
    for K in Ks:
        w = params[f'w{K}'].astype(jnp.bfloat16)        # (K, D, Co)
        b = params[f'b{K}'][0]                          # (Co,)
        T = x.shape[1] - K + 1
        s = jnp.zeros((x.shape[0], T, w.shape[-1]), jnp.float32)
        for k in range(K):
            s = s + jnp.einsum('ntd,dc->ntc', xb[:, k:k + T, :], w[k],
                               preferred_element_type=jnp.float32)
        s = jax.nn.relu(s + b)                          # ReLU(conv + bias)
        feats.append(jnp.max(s, axis=1))                # max_pool1d over full time
    feat = jnp.concatenate(feats, axis=-1)              # (N, len(Ks)*Co)
    wfc = params['fc_w'].astype(jnp.bfloat16).astype(jnp.float32)
    return jnp.dot(feat, wfc) + params['fc_b']          # dropout = identity (eval)


def init_params(key, D, Co, C, Ks=(3, 4, 5)):
    """PyTorch-default uniform init, stored in kernel-friendly layouts."""
    params = {}
    keys = jax.random.split(key, 2 * len(Ks) + 2)
    for i, K in enumerate(Ks):
        fan_in = 1 * K * D
        bound = 1.0 / jnp.sqrt(fan_in)
        params[f'w{K}'] = jax.random.uniform(
            keys[2 * i], (K, D, Co), jnp.float32, -bound, bound)
        params[f'b{K}'] = jax.random.uniform(
            keys[2 * i + 1], (1, Co), jnp.float32, -bound, bound)
    fan_in = len(Ks) * Co
    bound = 1.0 / jnp.sqrt(fan_in)
    params['fc_w'] = jax.random.uniform(
        keys[-2], (len(Ks) * Co, C), jnp.float32, -bound, bound)
    params['fc_b'] = jax.random.uniform(
        keys[-1], (1, C), jnp.float32, -bound, bound)
    return params


if __name__ == "__main__":
    # Small, module-consistent shapes (scaled down from D=300, Co=100; the
    # wrapper transparently zero-pads non-128-multiple dims like the real model's).
    N, L, D = 16, 16, 128        # batch, padded max seq len, embed_dim
    Co, C = 128, 8               # kernel_num, class_num
    Ks = (3, 4, 5)               # kernel_sizes

    key = jax.random.PRNGKey(0)
    kx, kp = jax.random.split(key)
    x = jax.random.normal(kx, (N, L, D), jnp.float32)
    params = init_params(kp, D, Co, C, Ks)

    logits = jax.block_until_ready(cnn_text_forward(x, params, Ks=Ks, tile_n=8))
    ref = ref_forward(x, params, Ks=Ks)

    assert logits.shape == (N, C), logits.shape
    err = float(jnp.max(jnp.abs(logits - ref)))
    assert jnp.allclose(logits, ref, atol=5e-3, rtol=5e-3), f"max abs err {err}"
    print("KERNEL_OK")
</pallas_src>

<mosaic_0001>
module attributes {stable_mosaic.version = 11 : i64} {
  func.func @_cnn_text_kernel(%arg0: i32, %arg1: memref<8x16x128xbf16, #tpu.memory_space<vmem>>, %arg2: memref<128x1536xbf16, #tpu.memory_space<vmem>>, %arg3: memref<3x128xf32, #tpu.memory_space<vmem>>, %arg4: memref<384x128xbf16, #tpu.memory_space<vmem>>, %arg5: memref<1x128xf32, #tpu.memory_space<vmem>>, %arg6: memref<8x128xf32, #tpu.memory_space<vmem>>) attributes {dimension_semantics = [#tpu.dimension_semantics<parallel>], iteration_bounds = array<i64: 2>, scalar_prefetch = 0 : i64, scratch_operands = 0 : i64, tpu.core_type = #tpu.core_type<tc>, window_params = [{transform_indices = @transform_0, window_bounds = array<i64: 8, 16, 128>}, {pipeline_mode = #tpu.pipeline_mode<synchronous>, transform_indices = @transform_1, window_bounds = array<i64: 128, 1536>}, {pipeline_mode = #tpu.pipeline_mode<synchronous>, transform_indices = @transform_2, window_bounds = array<i64: 3, 128>}, {pipeline_mode = #tpu.pipeline_mode<synchronous>, transform_indices = @transform_3, window_bounds = array<i64: 384, 128>}, {pipeline_mode = #tpu.pipeline_mode<synchronous>, transform_indices = @transform_4, window_bounds = array<i64: 1, 128>}, {transform_indices = @transform_5, window_bounds = array<i64: 8, 128>}]} {
    %c0 = arith.constant 0 : index
    %c0_0 = arith.constant 0 : index
    %c0_1 = arith.constant 0 : index
    %0 = vector.load %arg1[%c0, %c0_0, %c0_1] : memref<8x16x128xbf16, #tpu.memory_space<vmem>>, vector<8x16x128xbf16>
    %1 = vector.shape_cast %0 : vector<8x16x128xbf16> to vector<128x128xbf16>
    %c0_2 = arith.constant 0 : index
    %c0_3 = arith.constant 0 : index
    %2 = vector.load %arg2[%c0_2, %c0_3] : memref<128x1536xbf16, #tpu.memory_space<vmem>>, vector<128x1536xbf16>
    %cst = arith.constant dense<0.000000e+00> : vector<128x1536xf32>
    %3 = tpu.matmul %1, %2, %cst {dimension_numbers = #tpu.dot_dimension_numbers<[1], [0], [0], [1], [0, 0, 1, 1], [], []>} : vector<128x128xbf16>, vector<128x1536xbf16>, vector<128x1536xf32> -> vector<128x1536xf32>
    %4 = vector.shape_cast %3 : vector<128x1536xf32> to vector<8x16x1536xf32>
    %cst_4 = arith.constant 0.000000e+00 : f32
    %5 = vector.broadcast %cst_4 : f32 to vector<8x128xf32>
    %6 = vector.extract_strided_slice %4 {offsets = [0, 0, 0], sizes = [8, 14, 128], strides = [1, 1, 1]} : vector<8x16x1536xf32> to vector<8x14x128xf32>
    %7 = vector.extract_strided_slice %4 {offsets = [0, 1, 128], sizes = [8, 14, 128], strides = [1, 1, 1]} : vector<8x16x1536xf32> to vector<8x14x128xf32>
    %8 = arith.addf %6, %7 : vector<8x14x128xf32>
    %9 = vector.extract_strided_slice %4 {offsets = [0, 2, 256], sizes = [8, 14, 128], strides = [1, 1, 1]} : vector<8x16x1536xf32> to vector<8x14x128xf32>
    %10 = arith.addf %8, %9 : vector<8x14x128xf32>
    %cst_5 = arith.constant dense<0xFF800000> : vector<8x128xf32>
    %11 = vector.multi_reduction <maximumf>, %10, %cst_5 [1] : vector<8x14x128xf32> to vector<8x128xf32>
    %c0_6 = arith.constant 0 : index
    %c0_7 = arith.constant 0 : index
    %12 = vector.load %arg3[%c0_6, %c0_7] : memref<3x128xf32, #tpu.memory_space<vmem>>, vector<1x128xf32>
    %13 = vector.broadcast %12 : vector<1x128xf32> to vector<8x128xf32>
    %14 = arith.addf %11, %13 : vector<8x128xf32>
    %cst_8 = arith.constant 0.000000e+00 : f32
    %15 = vector.broadcast %cst_8 : f32 to vector<8x128xf32>
    %16 = arith.maximumf %14, %15 : vector<8x128xf32>
    %c0_9 = arith.constant 0 : index
    %c0_10 = arith.constant 0 : index
    %17 = vector.load %arg4[%c0_9, %c0_10] : memref<384x128xbf16, #tpu.memory_space<vmem>>, vector<128x128xbf16>
    %18 = arith.extf %17 : vector<128x128xbf16> to vector<128x128xf32>
    %cst_11 = arith.constant dense<0.000000e+00> : vector<8x128xf32>
    %19 = tpu.matmul %16, %18, %cst_11 {dimension_numbers = #tpu.dot_dimension_numbers<[1], [0], [0], [1], [0, 0, 1, 1], [], []>} : vector<8x128xf32>, vector<128x128xf32>, vector<8x128xf32> -> vector<8x128xf32>
    %20 = arith.addf %5, %19 : vector<8x128xf32>
    %21 = vector.extract_strided_slice %4 {offsets = [0, 0, 384], sizes = [8, 13, 128], strides = [1, 1, 1]} : vector<8x16x1536xf32> to vector<8x13x128xf32>
    %22 = vector.extract_strided_slice %4 {offsets = [0, 1, 512], sizes = [8, 13, 128], strides = [1, 1, 1]} : vector<8x16x1536xf32> to vector<8x13x128xf32>
    %23 = arith.addf %21, %22 : vector<8x13x128xf32>
    %24 = vector.extract_strided_slice %4 {offsets = [0, 2, 640], sizes = [8, 13, 128], strides = [1, 1, 1]} : vector<8x16x1536xf32> to vector<8x13x128xf32>
    %25 = arith.addf %23, %24 : vector<8x13x128xf32>
    %26 = vector.extract_strided_slice %4 {offsets = [0, 3, 768], sizes = [8, 13, 128], strides = [1, 1, 1]} : vector<8x16x1536xf32> to vector<8x13x128xf32>
    %27 = arith.addf %25, %26 : vector<8x13x128xf32>
    %cst_12 = arith.constant dense<0xFF800000> : vector<8x128xf32>
    %28 = vector.multi_reduction <maximumf>, %27, %cst_12 [1] : vector<8x13x128xf32> to vector<8x128xf32>
    %c1 = arith.constant 1 : index
    %c0_13 = arith.constant 0 : index
    %29 = vector.load %arg3[%c1, %c0_13] : memref<3x128xf32, #tpu.memory_space<vmem>>, vector<1x128xf32>
    %30 = vector.broadcast %29 : vector<1x128xf32> to vector<8x128xf32>
    %31 = arith.addf %28, %30 : vector<8x128xf32>
    %cst_14 = arith.constant 0.000000e+00 : f32
    %32 = vector.broadcast %cst_14 : f32 to vector<8x128xf32>
    %33 = arith.maximumf %31, %32 : vector<8x128xf32>
    %c128 = arith.constant 128 : index
    %c0_15 = arith.constant 0 : index
    %34 = vector.load %arg4[%c128, %c0_15] : memref<384x128xbf16, #tpu.memory_space<vmem>>, vector<128x128xbf16>
    %35 = arith.extf %34 : vector<128x128xbf16> to vector<128x128xf32>
    %cst_16 = arith.constant dense<0.000000e+00> : vector<8x128xf32>
    %36 = tpu.matmul %33, %35, %cst_16 {dimension_numbers = #tpu.dot_dimension_numbers<[1], [0], [0], [1], [0, 0, 1, 1], [], []>} : vector<8x128xf32>, vector<128x128xf32>, vector<8x128xf32> -> vector<8x128xf32>
    %37 = arith.addf %20, %36 : vector<8x128xf32>
    %38 = vector.extract_strided_slice %4 {offsets = [0, 0, 896], sizes = [8, 12, 128], strides = [1, 1, 1]} : vector<8x16x1536xf32> to vector<8x12x128xf32>
    %39 = vector.extract_strided_slice %4 {offsets = [0, 1, 1024], sizes = [8, 12, 128], strides = [1, 1, 1]} : vector<8x16x1536xf32> to vector<8x12x128xf32>
    %40 = arith.addf %38, %39 : vector<8x12x128xf32>
    %41 = vector.extract_strided_slice %4 {offsets = [0, 2, 1152], sizes = [8, 12, 128], strides = [1, 1, 1]} : vector<8x16x1536xf32> to vector<8x12x128xf32>
    %42 = arith.addf %40, %41 : vector<8x12x128xf32>
    %43 = vector.extract_strided_slice %4 {offsets = [0, 3, 1280], sizes = [8, 12, 128], strides = [1, 1, 1]} : vector<8x16x1536xf32> to vector<8x12x128xf32>
    %44 = arith.addf %42, %43 : vector<8x12x128xf32>
    %45 = vector.extract_strided_slice %4 {offsets = [0, 4, 1408], sizes = [8, 12, 128], strides = [1, 1, 1]} : vector<8x16x1536xf32> to vector<8x12x128xf32>
    %46 = arith.addf %44, %45 : vector<8x12x128xf32>
    %cst_17 = arith.constant dense<0xFF800000> : vector<8x128xf32>
    %47 = vector.multi_reduction <maximumf>, %46, %cst_17 [1] : vector<8x12x128xf32> to vector<8x128xf32>
    %c2 = arith.constant 2 : index
    %c0_18 = arith.constant 0 : index
    %48 = vector.load %arg3[%c2, %c0_18] : memref<3x128xf32, #tpu.memory_space<vmem>>, vector<1x128xf32>
    %49 = vector.broadcast %48 : vector<1x128xf32> to vector<8x128xf32>
    %50 = arith.addf %47, %49 : vector<8x128xf32>
    %cst_19 = arith.constant 0.000000e+00 : f32
    %51 = vector.broadcast %cst_19 : f32 to vector<8x128xf32>
    %52 = arith.maximumf %50, %51 : vector<8x128xf32>
    %c256 = arith.constant 256 : index
    %c0_20 = arith.constant 0 : index
    %53 = vector.load %arg4[%c256, %c0_20] : memref<384x128xbf16, #tpu.memory_space<vmem>>, vector<128x128xbf16>
    %54 = arith.extf %53 : vector<128x128xbf16> to vector<128x128xf32>
    %cst_21 = arith.constant dense<0.000000e+00> : vector<8x128xf32>
    %55 = tpu.matmul %52, %54, %cst_21 {dimension_numbers = #tpu.dot_dimension_numbers<[1], [0], [0], [1], [0, 0, 1, 1], [], []>} : vector<8x128xf32>, vector<128x128xf32>, vector<8x128xf32> -> vector<8x128xf32>
    %56 = arith.addf %37, %55 : vector<8x128xf32>
    %c0_22 = arith.constant 0 : index
    %c0_23 = arith.constant 0 : index
    %57 = vector.load %arg5[%c0_22, %c0_23] : memref<1x128xf32, #tpu.memory_space<vmem>>, vector<1x128xf32>
    %58 = vector.broadcast %57 : vector<1x128xf32> to vector<8x128xf32>
    %59 = arith.addf %56, %58 : vector<8x128xf32>
    %c0_24 = arith.constant 0 : index
    %c0_25 = arith.constant 0 : index
    %60 = vector.load %arg6[%c0_24, %c0_25] : memref<8x128xf32, #tpu.memory_space<vmem>>, vector<8x128xf32>
    tpu.vector_store %arg6[%c0_24, %c0_25], %59 {strides = array<i32>} : memref<8x128xf32, #tpu.memory_space<vmem>>, vector<8x128xf32>,
    return
  }
  func.func @transform_0(%arg0: i32) -> (i32, i32, i32) {
    %c0_i32 = arith.constant 0 : i32
    %c0_i32_0 = arith.constant 0 : i32
    %c0_i32_1 = arith.constant 0 : i32
    return %arg0, %c0_i32, %c0_i32_0 : i32, i32, i32
  }
  func.func @transform_1(%arg0: i32) -> (i32, i32) {
    %c0_i32 = arith.constant 0 : i32
    %c0_i32_0 = arith.constant 0 : i32
    %c0_i32_1 = arith.constant 0 : i32
    return %c0_i32, %c0_i32_0 : i32, i32
  }
  func.func @transform_2(%arg0: i32) -> (i32, i32) {
    %c0_i32 = arith.constant 0 : i32
    %c0_i32_0 = arith.constant 0 : i32
    %c0_i32_1 = arith.constant 0 : i32
    return %c0_i32, %c0_i32_0 : i32, i32
  }
  func.func @transform_3(%arg0: i32) -> (i32, i32) {
    %c0_i32 = arith.constant 0 : i32
    %c0_i32_0 = arith.constant 0 : i32
    %c0_i32_1 = arith.constant 0 : i32
    return %c0_i32, %c0_i32_0 : i32, i32
  }
  func.func @transform_4(%arg0: i32) -> (i32, i32) {
    %c0_i32 = arith.constant 0 : i32
    %c0_i32_0 = arith.constant 0 : i32
    %c0_i32_1 = arith.constant 0 : i32
    return %c0_i32, %c0_i32_0 : i32, i32
  }
  func.func @transform_5(%arg0: i32) -> (i32, i32) {
    %c0_i32 = arith.constant 0 : i32
    %c0_i32_0 = arith.constant 0 : i32
    return %arg0, %c0_i32 : i32, i32
  }
}

</mosaic_0001>

<bundles_post_ra>
// kernel: tpu_custom_call.1
= control target key start
LH: loop header
LB: loop body
LE: loop exit
PB: predicated region body
PF: predicated region fallthrough
CT: control target
= control target key end

     0   :  { %10 = vsyncpa [#allocation3], 0  ;;  %s4548_s0 = inlined_call_operand.hbm [shape: bf16[16,16,128], index: 0, kind: input, shape index: {}]   ;;  %s4549_s1 = inlined_call_operand.hbm [shape: bf16[128,1536], index: 1, kind: input, shape index: {}]   ;;  %s4550_s2 = inlined_call_operand.vmem [shape: f32[3,128], index: 2, kind: input, shape index: {}]   ;;  %s4551_s3 = inlined_call_operand.hbm [shape: bf16[384,128], index: 3, kind: input, shape index: {}]   ;;  %s4552_s4 = inlined_call_operand.vmem [shape: f32[1,128], index: 4, kind: input, shape index: {}]   ;;  %s4553_s5 = inlined_call_operand.hbm [shape: f32[16,128], index: 5, kind: output, shape index: {}]  }
   0x1   :  { %12 = vsyncpa [#allocation3 + $0x1], 0 }
   0x2   :  { %13 = vsyncpa [#allocation6], 0 }
   0x3   :  { %14 = vsyncpa [#allocation4], 0 }
   0x4   :  { %16 = vsyncpa [#allocation4 + $0x1], 0  ;;  %s3897_s18 = smov 0   ;;  %s3899_s19 = smov 0  }
   0x5   :  { %s3901_s20 = smov 0   ;;  %s3903_s21 = smov 0  }
   0x6 LB: > { %s3918_s22 = sadd.s32 4294967295, %s3853_s21   ;;  %s2995_s23 = sadd.s32 4294967294, %s3853_s21   ;;  %s3853_s21 = sphi %s3903_s21, %s4573_s21   ;;  %s3849_s20 = sphi %s3901_s20, %s4572_s20   ;;  %s3845_s19 = sphi %s3899_s19, %s4571_s19   ;;  %s3841_s18 = sphi %s3897_s18, %s4570_s18  }
   0x7   : > { %p42_p0 = scmp.ne.s32.totalorder %s3845_s19, %s3841_s18  ;;  %p4554_p1 = scmp.eq.s32.totalorder %s3918_s22, 0 }
   0x8   : > { %p156_p3 = scmp.eq.s32.totalorder %s2995_s23, 1  ;;  %p2996_p5 = scmp.ge.s32.totalorder %s3853_s21, 1 }
   0x9   : > { %p3927_p4 = por %p4554_p1, %p42_p0  ;;  %p163_p7 = scmp.lt.s32.totalorder %s3853_s21, 3 }
   0xa   : > { %p3932_p6 = por %p156_p3, %p42_p0  ;;  %s3855_s27 = smov [#allocation5]  }
   0xb   : > { %s4557_s24 = scalar_select %p3927_p4, 1, 0 }
   0xc   : > { %s4558_s25 = scalar_select %p3932_p6, 1, 0 }
   0xd   : > { %p3937_p8 = pnand %p2996_p5, %p163_p7  ;;  %s175_s28 = sshll.u32 %s3855_s27, 4  ;;  %s3941_s28 = int_to_ptr.vmem [resolvable:$true] %s175_s28 }
   0xe   : > { %s3856_s30 = smov [#allocation7]   ;;  %s3697_s9 = scalar_lea.hbm %s4549_s1, 12288 }
   0xf   : > { %p3482_p9 = pneg %p3937_p8  ;;  %s191_s6 = sshll.u32 %s3856_s30, 4  ;;  %s3952_s6 = int_to_ptr.vmem [resolvable:$true] %s191_s6 }
  0x10   : > { %p3698_p12 = scmp.ne.s32.totalorder %s4549_s1, %s3697_s9  ;;  %p3704_p5 = scmp.lt.u32.totalorder %s3697_s9, %s4549_s1 }
  0x11   : > { %p3948_p11 = pnand %p3482_p9, %p4554_p1 }
  0x13   : > { %p3699_p13 = pneg %p3948_p11 }
  0x15   : > { %p3700_p0 = pnand %p3699_p13, %p3698_p12 }
  0x17   : > { %p3701_p3 = pneg %p3700_p0 }
  0x19   : > { %p3706_p7 = pnand %p3704_p5, %p3701_p3 }
  0x1b   : > { %3709 = shalt.err (!%p3706_p7)
}
  0x1c   : > { %s3710_s14 = scalar_lea.vmem %s3941_s28, 12288  ;;  %p3718_p2 = scmp.lt.s32.totalorder %s3941_s28, %s3941_s28 }
  0x1d   : > { %p3711_p9 = scmp.ne.s32.totalorder %s3941_s28, %s3710_s14  ;;  %p3719_p12 = scmp.lt.s32.totalorder %s3710_s14, %s3710_s14 }
  0x1f   : > { %p3713_p10 = pnand %p3711_p9, %p3699_p13  ;;  %p3720_p0 = por %p3719_p12, %p3718_p2 }
  0x21   : > { %p3714_p1 = pneg %p3713_p10 }
  0x23   : > { %p3721_p6 = pnand %p3720_p0, %p3714_p1 }
  0x25   : > { %3724 = shalt.err (!%p3721_p6)
}
  0x26   : > { %s3857_s15 = smov 768   ;;  %s3858_s16 = smov 48  }
  0x27   : > { %3485 = dma.hbm_to_vmem [thread:$0]  (!%p3948_p11), %s4549_s1, 12288, %s3941_s28, [#allocation6], %s3857_s15, %s3857_s15, %s3858_s16  }
  0x28   : > { %s3725_s7 = scalar_lea.hbm %s4551_s3, 3072 }
  0x29   : > { %p3726_p2 = scmp.ne.s32.totalorder %s4551_s3, %s3725_s7  ;;  %p3732_p10 = scmp.lt.u32.totalorder %s3725_s7, %s4551_s3 }
  0x2b   : > { %p3728_p1 = pnand %p3726_p2, %p3699_p13 }
  0x2d   : > { %p3729_p6 = pneg %p3728_p1 }
  0x2f   : > { %p3734_p3 = pnand %p3732_p10, %p3729_p6 }
  0x31   : > { %3737 = shalt.err (!%p3734_p3)
}
  0x32   : > { %s3738_s28 = scalar_lea.vmem %s3952_s6, 3072  ;;  %p3746_p12 = scmp.lt.s32.totalorder %s3952_s6, %s3952_s6 }
  0x33   : > { %p3739_p5 = scmp.ne.s32.totalorder %s3952_s6, %s3738_s28  ;;  %p3747_p0 = scmp.lt.s32.totalorder %s3738_s28, %s3738_s28 }
  0x35   : > { %p3741_p7 = pnand %p3739_p5, %p3699_p13  ;;  %p3748_p2 = por %p3747_p0, %p3746_p12 }
  0x37   : > { %p3742_p9 = pneg %p3741_p7 }
  0x39   : > { %p3749_p1 = pnand %p3748_p2, %p3742_p9 }
  0x3b   : > { %3752 = shalt.err (!%p3749_p1)
}
  0x3c   : > { %s3859_s12 = smov 64   ;;  %s3860_s13 = smov 4  }
  0x3d   : > { %3488 = dma.hbm_to_vmem [thread:$0]  (!%p3948_p11), %s4551_s3, 3072, %s3952_s6, [#allocation6], %s3859_s12, %s3859_s12, %s3860_s13  }
  0x3e   : > { %s4010_s16 = sadd.s32 1, %s3853_s21   ;;  %s29_s23 = sadd.s32 1, %s3849_s20 }
  0x3f   : > { %s26_s17 = ssub.s32 %s3853_s21, %s4010_s16  ;;  %p36_p6 = scmp.ne.s32.totalorder %s3849_s20, %s3845_s19 }
  0x40   : > { %p27_p13 = scmp.eq.s32.totalorder %s26_s17, 0  ;;  %p37_p10 = scmp.eq.s32.totalorder %s3853_s21, 0 }
  0x41   : > { %p4561_p5 = scmp.eq.s32.totalorder %s3918_s22, 1  ;;  %p3499_p9 = scmp.lt.s32.totalorder %s3853_s21, 2 }
  0x42   : > { %s4019_s27 = scalar_select %p27_p13, %s3849_s20, %s29_s23  }
  0x43   : > { %p38_p3 = por %p37_p10, %p36_p6  ;;  %p4023_p7 = por %p4561_p5, %p36_p6 }
  0x44   : > { %s208_s30 = sand.u32 1, %s3849_s20   ;;  %s3122_s6 = sshll.u32 %s3853_s21, 10 }
  0x45   : > { %s4562_s29 = scalar_select %p4023_p7, 1, 0 }
  0x46   : > { %s3000_s7 = sshll.u32 %s208_s30, 6  ;;  %s4033_s10 = scalar_lea.hbm %s4548_s0, %s3122_s6 }
  0x47   : > { %s212_s11 = scalar_lea.vmem [#allocation2], %s3000_s7  ;;  %p4037_p11 = pnand %p3499_p9, %p38_p3 }
  0x48   : > { %s220_s28 = sshll.u32 %s212_s11, 4  ;;  %s4041_s15 = scalar_lea.sflag [#allocation3], %s208_s30  ;;  %s4035_s28 = int_to_ptr.vmem [resolvable:$true] %s220_s28 }
  0x49   : > { %s3753_s17 = scalar_lea.hbm %s4033_s10, 1024  ;;  %p3755_p0 = pneg %p4037_p11 }
  0x4a   : > { %p3754_p12 = scmp.ne.s32.totalorder %s4033_s10, %s3753_s17  ;;  %s3758_s6 = scalar_lea.hbm %s4548_s0, 2048 }
  0x4b   : > { %p3759_p13 = scmp.lt.u32.totalorder %s4033_s10, %s4548_s0  ;;  %p3760_p6 = scmp.lt.u32.totalorder %s3758_s6, %s3753_s17 }
  0x4c   : > { %p3756_p2 = pnand %p3755_p0, %p3754_p12  ;;  %p3762_p3 = scmp.lt.u32.totalorder %s3753_s17, %s4033_s10 }
  0x4d   : > { %p3761_p10 = por %p3760_p6, %p3759_p13 }
  0x4e   : > { %p3757_p1 = pneg %p3756_p2 }
  0x4f   : > { %p3763_p5 = por %p3762_p3, %p3761_p10 }
  0x51   : > { %p3764_p9 = pnand %p3763_p5, %p3757_p1 }
  0x53   : > { %3767 = shalt.err (!%p3764_p9)
}
  0x54   : > { %s3768_s30 = scalar_lea.vmem %s4035_s28, 1024  ;;  %s3861_s11 = smov [#allocation2]  }
  0x55   : > { %p3769_p12 = scmp.ne.s32.totalorder %s4035_s28, %s3768_s30  ;;  %s3773_s23 = sshll.u32 %s3861_s11, 4  ;;  %s3774_s23 = int_to_ptr.vmem [resolvable:$false] %s3773_s23 }
  0x56   : > { %s3775_s7 = scalar_lea.vmem %s3774_s23, 2048  ;;  %p3776_p4 = scmp.lt.s32.totalorder %s4035_s28, %s3774_s23 }
  0x57   : > { %p3771_p2 = pnand %p3769_p12, %p3755_p0  ;;  %p3777_p13 = scmp.lt.s32.totalorder %s3775_s7, %s3768_s30 }
  0x59   : > { %p3772_p7 = pneg %p3771_p2  ;;  %p3778_p6 = por %p3777_p13, %p3776_p4 }
  0x5b   : > { %p3779_p10 = pnand %p3778_p6, %p3772_p7 }
  0x5d   : > { %3782 = shalt.err (!%p3779_p10)
}
  0x5e   : > { %3492 = dma.hbm_to_vmem [thread:$0]  (!%p4037_p11), %s4033_s10, 1024, %s4035_s28, %s4041_s15, %s3859_s12, %s3859_s12, %s3860_s13  }
  0x5f   : > { %232 = sbr.rel (%p3937_p8) target bundleno = 800 (0x320), region = 40  ;;  %s4075_s17 = sand.u32 (!%p3937_p8), 1, %s3845_s19  }
  0x60   : > { %s3005_s6 = sshll.u32 (!%p3937_p8), %s4075_s17, 6  ;;  %s235_s8 = scalar_lea.sflag (!%p3937_p8), [#allocation3], %s4075_s17 }
  0x61   : > { %s4079_s9 = scalar_lea.vmem (!%p3937_p8), [#allocation2], %s3005_s6  ;;  %p4564_p4 = scmp.ne.s32.totalorder (!%p3937_p8), %s4557_s24, 0 }
  0x66   : > { %3828 = dma.done.wait (%p4564_p4), %s235_s8, 1024  }
  0x67   : > { %3830 = vsyncadd (%p4564_p4), %s235_s8, 4294966272  ;;  %p4565_p7 = scmp.eq.s32.totalorder %s3918_s22, 0 }
  0x69   : > { %3832 = dma.done.wait (%p4565_p7), [#allocation6], 15360   ;;  %p4566_p8 = pmov %p4565_p7 }
  0x6a   : > { %v3862_v0 = vmov 0   ;;  %v3545_v1 = vld [vmem:[#allocation5 + $0x4] ss:$48 sps:$4 sm:$0xff]   ;;  %v3547_v2 = vld [vmem:[#allocation5] ss:$48 sps:$4 sm:$0xff]   ;;  %v4098_v41 = vld [vmem:[%s4079_s9 + $0x8] sm:$0xff]  }
  0x6b   : > { %3834 = vsyncadd (%p4566_p8), [#allocation6], 4294951936  ;;  %947 = vmatprep.mubr.bf16.mxu0 %v3862_v0  ;;  %1060 = vmatprep.mubr.bf16.mxu1 %v3862_v0  ;;  %v3548_v3 = vld [vmem:[#allocation5 + $0xc] ss:$48 sps:$4 sm:$0xff]   ;;  %v3550_v4 = vld [vmem:[#allocation5 + $0x8] ss:$48 sps:$4 sm:$0xff]  }
  0x6c   : > { %915 = vmatprep.subr.bf16.mxu0 %v3545_v1  ;;  %v3551_v5 = vld [vmem:[#allocation5 + $0x64] ss:$48 sps:$4 sm:$0xff]   ;;  %v3553_v6 = vld [vmem:[#allocation5 + $0x60] ss:$48 sps:$4 sm:$0xff]   ;;  %1028 = vmatprep.subr.bf16.mxu1 %v3548_v3  ;;  %v3554_v7 = vld [vmem:[#allocation5 + $0x6c] ss:$48 sps:$4 sm:$0xff]  }
  0x6d   : > { %916 = vmatpush1.bf16.msra.mxu0 %v3547_v2  ;;  %1029 = vmatpush1.bf16.msra.mxu1 %v3550_v4  ;;  %v3556_v8 = vld [vmem:[#allocation5 + $0x68] ss:$48 sps:$4 sm:$0xff]   ;;  %v3557_v9 = vld [vmem:[#allocation5 + $0xc4] ss:$48 sps:$4 sm:$0xff]   ;;  %v3559_v10 = vld [vmem:[#allocation5 + $0xc0] ss:$48 sps:$4 sm:$0xff]  }
  0x6e   : > { %917 = vmatprep.subr.bf16.mxu0 %v3551_v5  ;;  %1030 = vmatprep.subr.bf16.mxu1 %v3554_v7  ;;  %v3560_v11 = vld [vmem:[#allocation5 + $0xcc] ss:$48 sps:$4 sm:$0xff]   ;;  %v3563_v12 = vld [vmem:[#allocation5 + $0x124] ss:$48 sps:$4 sm:$0xff]   ;;  %v3562_v13 = vld [vmem:[#allocation5 + $0xc8] ss:$48 sps:$4 sm:$0xff]  }
  0x6f   : > { %v3566_v14 = vld [vmem:[#allocation5 + $0x12c] ss:$48 sps:$4 sm:$0xff]   ;;  %v3565_v15 = vld [vmem:[#allocation5 + $0x120] ss:$48 sps:$4 sm:$0xff]   ;;  %v3569_v16 = vld [vmem:[#allocation5 + $0x184] ss:$48 sps:$4 sm:$0xff]  }
  0x70   : > { %v3568_v17 = vld [vmem:[#allocation5 + $0x128] ss:$48 sps:$4 sm:$0xff]   ;;  %v3572_v18 = vld [vmem:[#allocation5 + $0x18c] ss:$48 sps:$4 sm:$0xff]   ;;  %v3571_v19 = vld [vmem:[#allocation5 + $0x180] ss:$48 sps:$4 sm:$0xff]  }
  0x71   : > { %918 = vmatpush1.bf16.msra.mxu0 %v3553_v6  ;;  %1031 = vmatpush1.bf16.msra.mxu1 %v3556_v8  ;;  %v3575_v20 = vld [vmem:[#allocation5 + $0x1e4] ss:$48 sps:$4 sm:$0xff]   ;;  %v3574_v21 = vld [vmem:[#allocation5 + $0x188] ss:$48 sps:$4 sm:$0xff]   ;;  %v3578_v22 = vld [vmem:[#allocation5 + $0x1ec] ss:$48 sps:$4 sm:$0xff]  }
  0x72   : > { %919 = vmatprep.subr.bf16.mxu0 %v3557_v9  ;;  %1032 = vmatprep.subr.bf16.mxu1 %v3560_v11  ;;  %v3577_v23 = vld [vmem:[#allocation5 + $0x1e0] ss:$48 sps:$4 sm:$0xff]   ;;  %v3581_v24 = vld [vmem:[#allocation5 + $0x244] ss:$48 sps:$4 sm:$0xff]   ;;  %v3580_v25 = vld [vmem:[#allocation5 + $0x1e8] ss:$48 sps:$4 sm:$0xff]  }
  0x73   : > { %v3584_v26 = vld [vmem:[#allocation5 + $0x24c] ss:$48 sps:$4 sm:$0xff]   ;;  %v3583_v27 = vld [vmem:[#allocation5 + $0x240] ss:$48 sps:$4 sm:$0xff]   ;;  %v3587_v28 = vld [vmem:[#allocation5 + $0x2a4] ss:$48 sps:$4 sm:$0xff]  }
  0x74   : > { %v3586_v29 = vld [vmem:[#allocation5 + $0x248] ss:$48 sps:$4 sm:$0xff]   ;;  %v3590_v30 = vld [vmem:[#allocation5 + $0x2ac] ss:$48 sps:$4 sm:$0xff]   ;;  %v3589_v31 = vld [vmem:[#allocation5 + $0x2a0] ss:$48 sps:$4 sm:$0xff]  }
  0x75   : > { %920 = vmatpush1.bf16.msra.mxu0 %v3559_v10  ;;  %1033 = vmatpush1.bf16.msra.mxu1 %v3562_v13  ;;  %v3596_v32 = vld [vmem:[#allocation5 + $0x14] ss:$48 sps:$4 sm:$0xff]   ;;  %v3592_v33 = vld [vmem:[#allocation5 + $0x2a8] ss:$48 sps:$4 sm:$0xff]   ;;  %v3599_v35 = vld [vmem:[#allocation5 + $0x1c] ss:$48 sps:$4 sm:$0xff]  }
  0x76   : > { %921 = vmatprep.subr.bf16.mxu0 %v3563_v12  ;;  %1034 = vmatprep.subr.bf16.mxu1 %v3566_v14  ;;  %v4092_v34 = vld [vmem:[%s4079_s9] sm:$0xff]   ;;  %v3597_v38 = vld [vmem:[#allocation5 + $0x18] ss:$48 sps:$4 sm:$0xff]   ;;  %v3606_v39 = vld [vmem:[#allocation5 + $0x7c] ss:$48 sps:$4 sm:$0xff]   ;;  %vm3864_vm0 = vmmov 0  }
  0x77   : > { %v3594_v36 = vld [vmem:[#allocation5 + $0x10] ss:$48 sps:$4 sm:$0xff]   ;;  %v3603_v37 = vld [vmem:[#allocation5 + $0x74] ss:$48 sps:$4 sm:$0xff]   ;;  %v3604_v43 = vld [vmem:[#allocation5 + $0x78] ss:$48 sps:$4 sm:$0xff]  }
  0x78   : > { %v3601_v40 = vld [vmem:[#allocation5 + $0x70] ss:$48 sps:$4 sm:$0xff]   ;;  %v3610_v42 = vld [vmem:[#allocation5 + $0xd4] ss:$48 sps:$4 sm:$0xff]   ;;  %v3613_v44 = vld [vmem:[#allocation5 + $0xdc] ss:$48 sps:$4 sm:$0xff]  }
  0x79   : > { %922 = vmatpush1.bf16.msra.mxu0 %v3565_v15  ;;  %1035 = vmatpush1.bf16.msra.mxu1 %v3568_v17  ;;  %v3608_v45 = vld [vmem:[#allocation5 + $0xd0] ss:$48 sps:$4 sm:$0xff]   ;;  %v3617_v46 = vld [vmem:[#allocation5 + $0x134] ss:$48 sps:$4 sm:$0xff]   ;;  %v3611_v47 = vld [vmem:[#allocation5 + $0xd8] ss:$48 sps:$4 sm:$0xff]  }
  0x7a   : > { %923 = vmatprep.subr.bf16.mxu0 %v3569_v16  ;;  %1036 = vmatprep.subr.bf16.mxu1 %v3572_v18  ;;  %v3620_v48 = vld [vmem:[#allocation5 + $0x13c] ss:$48 sps:$4 sm:$0xff]   ;;  %v3615_v49 = vld [vmem:[#allocation5 + $0x130] ss:$48 sps:$4 sm:$0xff]   ;;  %v3624_v50 = vld [vmem:[#allocation5 + $0x194] ss:$48 sps:$4 sm:$0xff]  }
  0x7b   : > { %v3618_v51 = vld [vmem:[#allocation5 + $0x138] ss:$48 sps:$4 sm:$0xff]   ;;  %v4106_v52 = vld [vmem:[%s4079_s9 + $0x10] sm:$0xff]   ;;  %v3627_v53 = vld [vmem:[#allocation5 + $0x19c] ss:$48 sps:$4 sm:$0xff]   ;;  %vm1609_vm1 = vcmask 1046528  }
  0x7c   : > { %v3622_v54 = vld [vmem:[#allocation5 + $0x190] ss:$48 sps:$4 sm:$0xff]   ;;  %v3631_v55 = vld [vmem:[#allocation5 + $0x1f4] ss:$48 sps:$4 sm:$0xff]   ;;  %v3625_v56 = vld [vmem:[#allocation5 + $0x198] ss:$48 sps:$4 sm:$0xff]  }
  0x7d   : > { %924 = vmatpush1.bf16.msra.mxu0 %v3571_v19  ;;  %1037 = vmatpush1.bf16.msra.mxu1 %v3574_v21  ;;  %v3634_v57 = vld [vmem:[#allocation5 + $0x1fc] ss:$48 sps:$4 sm:$0xff]   ;;  %v3629_v58 = vld [vmem:[#allocation5 + $0x1f0] ss:$48 sps:$4 sm:$0xff]   ;;  %v3638_v59 = vld [vmem:[#allocation5 + $0x254] ss:$48 sps:$4 sm:$0xff]  }
  0x7e   : > { %925 = vmatprep.subr.bf16.mxu0 %v3575_v20  ;;  %1038 = vmatprep.subr.bf16.mxu1 %v3578_v22  ;;  %v3632_v60 = vld [vmem:[#allocation5 + $0x1f8] ss:$48 sps:$4 sm:$0xff]   ;;  %v3641_v62 = vld [vmem:[#allocation5 + $0x25c] ss:$48 sps:$4 sm:$0xff]   ;;  %v3636_v63 = vld [vmem:[#allocation5 + $0x250] ss:$48 sps:$4 sm:$0xff]  }
  0x7f   : > { %v4113_v61 = vld [vmem:[%s4079_s9 + $0x18] sm:$0xff]   ;;  %v3645_v1 = vld [vmem:[#allocation5 + $0x2b4] ss:$48 sps:$4 sm:$0xff]   ;;  %v3643_v4 = vld [vmem:[#allocation5 + $0x2b0] ss:$48 sps:$4 sm:$0xff]   ;;  %vm1682_vm2 = vcmask 1045504  }
  0x80   : > { %v3639_v2 = vld [vmem:[#allocation5 + $0x258] ss:$48 sps:$4 sm:$0xff]   ;;  %v3648_v3 = vld [vmem:[#allocation5 + $0x2bc] ss:$48 sps:$4 sm:$0xff]   ;;  %v3651_v5 = vld [vmem:[#allocation5 + $0x24] ss:$48 sps:$4 sm:$0xff]  }
  0x81   : > { %926 = vmatpush1.bf16.msra.mxu0 %v3577_v23  ;;  %1039 = vmatpush1.bf16.msra.mxu1 %v3580_v25  ;;  %v3646_v6 = vld [vmem:[#allocation5 + $0x2b8] ss:$48 sps:$4 sm:$0xff]   ;;  %v4120_v7 = vld [vmem:[%s4079_s9 + $0x20] sm:$0xff]   ;;  %v3654_v8 = vld [vmem:[#allocation5 + $0x2c] ss:$48 sps:$4 sm:$0xff]   ;;  %vm2199_vm3 = vcmask 1041409  }
  0x82   : > { %927 = vmatprep.subr.bf16.mxu0 %v3581_v24  ;;  %1040 = vmatprep.subr.bf16.mxu1 %v3584_v26  ;;  %v4127_v9 = vld [vmem:[%s4079_s9 + $0x28] sm:$0xff]   ;;  %v4134_v10 = vld [vmem:[%s4079_s9 + $0x30] sm:$0xff]   ;;  %v4141_v11 = vld [vmem:[%s4079_s9 + $0x38] sm:$0xff]   ;;  %vm2202_vm4 = vcmask 1042434   ;;  %vm2205_vm5 = vcmask 1043459   ;;  %vm2208_vm6 = vcmask 1044484  }
  0x83   : > { %v3649_v12 = vld [vmem:[#allocation5 + $0x20] ss:$48 sps:$4 sm:$0xff]   ;;  %v3657_v13 = vld [vmem:[#allocation5 + $0x84] ss:$48 sps:$4 sm:$0xff]   ;;  %v3652_v14 = vld [vmem:[#allocation5 + $0x28] ss:$48 sps:$4 sm:$0xff]  }
  0x84   : > { %v3660_v15 = vld [vmem:[#allocation5 + $0x8c] ss:$48 sps:$4 sm:$0xff]   ;;  %v3655_v16 = vld [vmem:[#allocation5 + $0x80] ss:$48 sps:$4 sm:$0xff]   ;;  %v3663_v17 = vld [vmem:[#allocation5 + $0xe4] ss:$48 sps:$4 sm:$0xff]  }
  0x85   : > { %928 = vmatpush1.bf16.msra.mxu0 %v3583_v27  ;;  %1041 = vmatpush1.bf16.msra.mxu1 %v3586_v29  ;;  %v3658_v18 = vld [vmem:[#allocation5 + $0x88] ss:$48 sps:$4 sm:$0xff]   ;;  %v3666_v19 = vld [vmem:[#allocation5 + $0xec] ss:$48 sps:$4 sm:$0xff]   ;;  %v3661_v20 = vld [vmem:[#allocation5 + $0xe0] ss:$48 sps:$4 sm:$0xff]  }
  0x86   : > { %929 = vmatprep.subr.bf16.mxu0 %v3587_v28  ;;  %1042 = vmatprep.subr.bf16.mxu1 %v3590_v30  ;;  %v3669_v21 = vld [vmem:[#allocation5 + $0x144] ss:$48 sps:$4 sm:$0xff]   ;;  %v3664_v22 = vld [vmem:[#allocation5 + $0xe8] ss:$48 sps:$4 sm:$0xff]   ;;  %v3672_v23 = vld [vmem:[#allocation5 + $0x14c] ss:$48 sps:$4 sm:$0xff]  }
  0x87   : > { %v3667_v24 = vld [vmem:[#allocation5 + $0x140] ss:$48 sps:$4 sm:$0xff]   ;;  %v3675_v25 = vld [vmem:[#allocation5 + $0x1a4] ss:$48 sps:$4 sm:$0xff]   ;;  %v3670_v26 = vld [vmem:[#allocation5 + $0x148] ss:$48 sps:$4 sm:$0xff]  }
  0x88   : > { %v3678_v27 = vld [vmem:[#allocation5 + $0x1ac] ss:$48 sps:$4 sm:$0xff]   ;;  %v3673_v28 = vld [vmem:[#allocation5 + $0x1a0] ss:$48 sps:$4 sm:$0xff]   ;;  %v3681_v29 = vld [vmem:[#allocation5 + $0x204] ss:$48 sps:$4 sm:$0xff]  }
  0x89   : > { %930 = vmatpush1.bf16.msra.mxu0 %v3589_v31  ;;  %1043 = vmatpush1.bf16.msra.mxu1 %v3592_v33  ;;  %v3676_v30 = vld [vmem:[#allocation5 + $0x1a8] ss:$48 sps:$4 sm:$0xff]   ;;  %v3684_v31 = vld [vmem:[#allocation5 + $0x20c] ss:$48 sps:$4 sm:$0xff]   ;;  %v3687_v33 = vld [vmem:[#allocation5 + $0x264] ss:$48 sps:$4 sm:$0xff]  }
  0x8a   : > { %1141 = vmatprep.subr.bf16.mxu0 %v3596_v32  ;;  %1254 = vmatprep.subr.bf16.mxu1 %v3599_v35  ;;  %v3679_v32 = vld [vmem:[#allocation5 + $0x200] ss:$48 sps:$4 sm:$0xff]   ;;  %v3682_v35 = vld [vmem:[#allocation5 + $0x208] ss:$48 sps:$4 sm:$0xff]   ;;  %vm2016_vm7 = vcmask 1044480   ;;  %vm2211_vm8 = vcmask 1045509  }
  0x8b   : > { %vm2214_vm9 = vcmask 1046534   ;;  %vm2217_vm10 = vcmask 1047559   ;;  %vm2615_vm11 = vcmask 1043456   ;;  %s3008_s14 = sshll.u32 %s4075_s17, 3  ;;  %s3118_s11 = sshll.u32 %s3918_s22, 7 }
  0x8c   : > { %948 = vmatmul.mubr.bf16.vlgmr.msra.gmra.mrb[0].mxu0 %v4092_v34  ;;  %1061 = vmatmul.mubr.bf16.vlgmr.msra.gmra.mrb[0].mxu1 %v4092_v34  ;;  %s272_s23 = scalar_lea.vmem [#allocation8], %s3008_s14  ;;  %s4504_s9 = scalar_lea.hbm %s4553_s5, %s3118_s11 }
  0x8d   : > { %1142 = vmatpush1.bf16.msra.mxu0 %v3594_v36  ;;  %957 = vmatprep.mubr.bf16.mxu0 %v3862_v0  ;;  %v3690_v36 = vld [vmem:[#allocation5 + $0x26c] ss:$48 sps:$4 sm:$0xff]   ;;  %s2906_s7 = sshll.u32 %s272_s23, 4  ;;  %s2893_s24 = scalar_lea.sflag [#allocation4], %s4075_s17  ;;  %s4506_s7 = int_to_ptr.vmem [resolvable:$true] %s2906_s7 }
  0x8e   : > { %1143 = vmatprep.subr.bf16.mxu0 %v3603_v37  ;;  %1255 = vmatpush1.bf16.msra.mxu1 %v3597_v38  ;;  %v3685_v37 = vld [vmem:[#allocation5 + $0x260] ss:$48 sps:$4 sm:$0xff]   ;;  %v3693_v38 = vld [vmem:[#allocation5 + $0x2c4] ss:$48 sps:$4 sm:$0xff]   ;;  %s3783_s26 = scalar_lea.vmem %s4506_s7, 128  ;;  %p4567_p0 = scmp.ne.s32.totalorder %s4562_s29, 0 }
  0x8f   : > { %1070 = vmatprep.mubr.bf16.mxu1 %v3862_v0  ;;  %1256 = vmatprep.subr.bf16.mxu1 %v3606_v39  ;;  %v3688_v39 = vld [vmem:[#allocation5 + $0x268] ss:$48 sps:$4 sm:$0xff]   ;;  %p3784_p11 = scmp.ne.s32.totalorder %s4506_s7, %s3783_s26  ;;  %s3866_s22 = smov [#allocation8]  }
  0x90   : > { %s3787_s12 = sshll.u32 %s3866_s22, 4  ;;  %s3788_s12 = int_to_ptr.vmem [resolvable:$false] %s3787_s12 }
  0x91   : > { %1144 = vmatpush1.bf16.msra.mxu0 %v3601_v40  ;;  %v3696_v40 = vld [vmem:[#allocation5 + $0x2cc] ss:$48 sps:$4 sm:$0xff]   ;;  %p3785_p1 = pnand %p3784_p11, %p4567_p0  ;;  %s3789_s13 = scalar_lea.vmem %s3788_s12, 256 }
  0x92   : > { %1145 = vmatprep.subr.bf16.mxu0 %v3610_v42  ;;  %1257 = vmatpush1.bf16.msra.mxu1 %v3604_v43  ;;  %v3691_v42 = vld [vmem:[#allocation5 + $0x2c0] ss:$48 sps:$4 sm:$0xff]   ;;  %v3694_v43 = vld [vmem:[#allocation5 + $0x2c8] ss:$48 sps:$4 sm:$0xff]   ;;  %p3790_p5 = scmp.lt.s32.totalorder %s4506_s7, %s3788_s12  ;;  %p3791_p9 = scmp.lt.s32.totalorder %s3789_s13, %s3783_s26 }
  0x93   : > { %1258 = vmatprep.subr.bf16.mxu1 %v3613_v44  ;;  %v3863_v44 = vmov 0.0|0.0   ;;  %p3786_p3 = pneg %p3785_p1 }
  0x94   : > { %958 = vmatmul.mubr.bf16.gmra.mrb[4].mxu0 %v4098_v41  ;;  %1071 = vmatmul.mubr.bf16.gmra.mrb[4].mxu1 %v4098_v41  ;;  %p3792_p12 = por %p3791_p9, %p3790_p5 }
  0x95   : > { %967 = vmatprep.mubr.bf16.mxu0 %v3862_v0  ;;  %1146 = vmatpush1.bf16.msra.mxu0 %v3608_v45  ;;  %v3124_v45 = vld [vmem:[#allocation7] sm:$0xff]  }
  0x96   : > { %1147 = vmatprep.subr.bf16.mxu0 %v3617_v46  ;;  %1080 = vmatprep.mubr.bf16.mxu1 %v3862_v0  ;;  %v3221_v46 = vld [vmem:[#allocation7 + $0x18] sm:$0xff]   ;;  %p3793_p2 = pnand %p3792_p12, %p3786_p3 }
  0x97   : > { %1259 = vmatpush1.bf16.msra.mxu1 %v3611_v47  ;;  %v3222_v47 = vld [vmem:[#allocation7 + $0x20] sm:$0xff]  }
  0x98   : > { %1260 = vmatprep.subr.bf16.mxu1 %v3620_v48  ;;  %v3223_v48 = vld [vmem:[#allocation7 + $0x28] sm:$0xff]  }
  0x99   : > { %1148 = vmatpush1.bf16.msra.mxu0 %v3615_v49  ;;  %v3224_v49 = vld [vmem:[#allocation7 + $0x30] sm:$0xff]  }
  0x9a   : > { %1149 = vmatprep.subr.bf16.mxu0 %v3624_v50  ;;  %v3225_v50 = vld [vmem:[#allocation7 + $0x38] sm:$0xff]  }
  0x9b   : > { %1261 = vmatpush1.bf16.msra.mxu1 %v3618_v51  ;;  %v3865_v51 = vmov 0.0  }
  0x9c   : > { %968 = vmatmul.mubr.bf16.gmra.mrb[8].mxu0 %v4106_v52  ;;  %1262 = vmatprep.subr.bf16.mxu1 %v3627_v53  ;;  %v3227_v53 = vld [vmem:[#allocation7 + $0x48] sm:$0xff]  }
  0x9d   : > { %977 = vmatprep.mubr.bf16.mxu0 %v3862_v0  ;;  %1150 = vmatpush1.bf16.msra.mxu0 %v3622_v54 }
  0x9e   : > { %1081 = vmatmul.mubr.bf16.gmra.mrb[8].mxu1 %v4106_v52  ;;  %1151 = vmatprep.subr.bf16.mxu0 %v3631_v55 }
  0x9f   : > { %1090 = vmatprep.mubr.bf16.mxu1 %v3862_v0  ;;  %1263 = vmatpush1.bf16.msra.mxu1 %v3625_v56 }
  0xa0   : > { %1264 = vmatprep.subr.bf16.mxu1 %v3634_v57  ;;  %v3228_v57 = vld [vmem:[#allocation7 + $0x50] sm:$0xff]  }
  0xa1   : > { %1152 = vmatpush1.bf16.msra.mxu0 %v3629_v58 }
  0xa2   : > { %1153 = vmatprep.subr.bf16.mxu0 %v3638_v59 }
  0xa3   : > { %1265 = vmatpush1.bf16.msra.mxu1 %v3632_v60 }
  0xa4   : > { %978 = vmatmul.mubr.bf16.gmra.mrb[12].mxu0 %v4113_v61  ;;  %1266 = vmatprep.subr.bf16.mxu1 %v3641_v62 }
  0xa5   : > { %987 = vmatprep.mubr.bf16.mxu0 %v3862_v0  ;;  %1154 = vmatpush1.bf16.msra.mxu0 %v3636_v63 }
  0xa6   : > { %1091 = vmatmul.mubr.bf16.gmra.mrb[12].mxu1 %v4113_v61  ;;  %1155 = vmatprep.subr.bf16.mxu0 %v3645_v1 }
  0xa7   : > { %1100 = vmatprep.mubr.bf16.mxu1 %v3862_v0  ;;  %1267 = vmatpush1.bf16.msra.mxu1 %v3639_v2 }
  0xa8   : > { %1268 = vmatprep.subr.bf16.mxu1 %v3648_v3 }
  0xa9   : > { %1156 = vmatpush1.bf16.msra.mxu0 %v3643_v4 }
  0xaa   : > { %1367 = vmatprep.subr.bf16.mxu0 %v3651_v5 }
  0xab   : > { %1269 = vmatpush1.bf16.msra.mxu1 %v3646_v6 }
  0xac   : > { %988 = vmatmul.mubr.bf16.gmra.mrb[16].mxu0 %v4120_v7  ;;  %1480 = vmatprep.subr.bf16.mxu1 %v3654_v8 }
  0xad   : > { %997 = vmatprep.mubr.bf16.mxu0 %v3862_v0 }
  0xae   : > { %1101 = vmatmul.mubr.bf16.gmra.mrb[16].mxu1 %v4120_v7 }
  0xaf   : > { %1110 = vmatprep.mubr.bf16.mxu1 %v3862_v0 }
  0xb4   : > { %998 = vmatmul.mubr.bf16.gmra.mrb[20].mxu0 %v4127_v9 }
  0xb5   : > { %1007 = vmatprep.mubr.bf16.mxu0 %v3862_v0 }
  0xb6   : > { %1111 = vmatmul.mubr.bf16.gmra.mrb[20].mxu1 %v4127_v9 }
  0xb7   : > { %1120 = vmatprep.mubr.bf16.mxu1 %v3862_v0 }
  0xbc   : > { %1008 = vmatmul.mubr.bf16.gmra.mrb[24].mxu0 %v4134_v10 }
  0xbd   : > { %1017 = vmatprep.mubr.bf16.mxu0 %v3862_v0 }
  0xbe   : > { %1121 = vmatmul.mubr.bf16.gmra.mrb[24].mxu1 %v4134_v10 }
  0xbf   : > { %1130 = vmatprep.mubr.bf16.mxu1 %v3862_v0 }
  0xc4   : > { %1018 = vmatmul.mubr.bf16.gmra.mrb[28].mxu0 %v4141_v11 }
  0xc5   : > { %1173 = vmatprep.mubr.bf16.mxu0 %v3862_v0 }
  0xc6   : > { %1131 = vmatmul.mubr.bf16.gmra.mrb[28].mxu1 %v4141_v11 }
  0xc7   : > { %1286 = vmatprep.mubr.bf16.mxu1 %v3862_v0 }
  0xcc   : > { %1174 = vmatmul.mubr.bf16.vlgmr.msra.gmra.mrb[32].mxu0 %v4092_v34 }
  0xcd   : > { %1368 = vmatpush1.bf16.msra.mxu0 %v3649_v12  ;;  %1183 = vmatprep.mubr.bf16.mxu0 %v3862_v0 }
  0xce   : > { %1287 = vmatmul.mubr.bf16.vlgmr.msra.gmra.mrb[32].mxu1 %v4092_v34  ;;  %1369 = vmatprep.subr.bf16.mxu0 %v3657_v13 }
  0xcf   : > { %1481 = vmatpush1.bf16.msra.mxu1 %v3652_v14  ;;  %1296 = vmatprep.mubr.bf16.mxu1 %v3862_v0 }
  0xd0   : > { %1482 = vmatprep.subr.bf16.mxu1 %v3660_v15 }
  0xd1   : > { %1370 = vmatpush1.bf16.msra.mxu0 %v3655_v16 }
  0xd2   : > { %1371 = vmatprep.subr.bf16.mxu0 %v3663_v17 }
  0xd3   : > { %1483 = vmatpush1.bf16.msra.mxu1 %v3658_v18 }
  0xd4   : > { %1184 = vmatmul.mubr.bf16.gmra.mrb[36].mxu0 %v4098_v41  ;;  %1484 = vmatprep.subr.bf16.mxu1 %v3666_v19  ;;  %v3230_v19 = vld [vmem:[#allocation7 + $0x60] sm:$0xff]  }
  0xd5   : > { %1193 = vmatprep.mubr.bf16.mxu0 %v3862_v0  ;;  %1372 = vmatpush1.bf16.msra.mxu0 %v3661_v20 }
  0xd6   : > { %1297 = vmatmul.mubr.bf16.gmra.mrb[36].mxu1 %v4098_v41  ;;  %1373 = vmatprep.subr.bf16.mxu0 %v3669_v21 }
  0xd7   : > { %1306 = vmatprep.mubr.bf16.mxu1 %v3862_v0  ;;  %1485 = vmatpush1.bf16.msra.mxu1 %v3664_v22 }
  0xd8   : > { %1486 = vmatprep.subr.bf16.mxu1 %v3672_v23 }
  0xd9   : > { %1374 = vmatpush1.bf16.msra.mxu0 %v3667_v24 }
  0xda   : > { %1375 = vmatprep.subr.bf16.mxu0 %v3675_v25 }
  0xdb   : > { %1487 = vmatpush1.bf16.msra.mxu1 %v3670_v26 }
  0xdc   : > { %1194 = vmatmul.mubr.bf16.gmra.mrb[40].mxu0 %v4106_v52  ;;  %1488 = vmatprep.subr.bf16.mxu1 %v3678_v27 }
  0xdd   : > { %1203 = vmatprep.mubr.bf16.mxu0 %v3862_v0  ;;  %1376 = vmatpush1.bf16.msra.mxu0 %v3673_v28 }
  0xde   : > { %1307 = vmatmul.mubr.bf16.gmra.mrb[40].mxu1 %v4106_v52  ;;  %1377 = vmatprep.subr.bf16.mxu0 %v3681_v29 }
  0xdf   : > { %1316 = vmatprep.mubr.bf16.mxu1 %v3862_v0  ;;  %1489 = vmatpush1.bf16.msra.mxu1 %v3676_v30 }
  0xe0   : > { %1490 = vmatprep.subr.bf16.mxu1 %v3684_v31  ;;  %v3231_v31 = vld [vmem:[#allocation7 + $0x68] sm:$0xff]  }
  0xe1   : > { %1378 = vmatpush1.bf16.msra.mxu0 %v3679_v32 }
  0xe2   : > { %1379 = vmatprep.subr.bf16.mxu0 %v3687_v33 }
  0xe3   : > { %1491 = vmatpush1.bf16.msra.mxu1 %v3682_v35 }
  0xe4   : > { %1204 = vmatmul.mubr.bf16.gmra.mrb[44].mxu0 %v4113_v61  ;;  %1492 = vmatprep.subr.bf16.mxu1 %v3690_v36 }
  0xe5   : > { %1213 = vmatprep.mubr.bf16.mxu0 %v3862_v0  ;;  %1380 = vmatpush1.bf16.msra.mxu0 %v3685_v37 }
  0xe6   : > { %1317 = vmatmul.mubr.bf16.gmra.mrb[44].mxu1 %v4113_v61  ;;  %1381 = vmatprep.subr.bf16.mxu0 %v3693_v38 }
  0xe7   : > { %1326 = vmatprep.mubr.bf16.mxu1 %v3862_v0  ;;  %1493 = vmatpush1.bf16.msra.mxu1 %v3688_v39 }
  0xe8   : > { %1494 = vmatprep.subr.bf16.mxu1 %v3696_v40 }
  0xe9   : > { %1382 = vmatpush1.bf16.msra.mxu0 %v3691_v42 }
  0xea   : > { %3398 = vmatprep.subr.bf16.mxu0 %v3863_v44 }
  0xeb   : > { %1495 = vmatpush1.bf16.msra.mxu1 %v3694_v43 }
  0xec   : > { %1214 = vmatmul.mubr.bf16.gmra.mrb[48].mxu0 %v4120_v7  ;;  %3422 = vmatprep.subr.bf16.mxu1 %v3863_v44 }
  0xed   : > { %1223 = vmatprep.mubr.bf16.mxu0 %v3862_v0 }
  0xee   : > { %1327 = vmatmul.mubr.bf16.gmra.mrb[48].mxu1 %v4120_v7 }
  0xef   : > { %1336 = vmatprep.mubr.bf16.mxu1 %v3862_v0 }
  0xf4   : > { %1224 = vmatmul.mubr.bf16.gmra.mrb[52].mxu0 %v4127_v9 }
  0xf5   : > { %1233 = vmatprep.mubr.bf16.mxu0 %v3862_v0 }
  0xf6   : > { %1337 = vmatmul.mubr.bf16.gmra.mrb[52].mxu1 %v4127_v9 }
  0xf7   : > { %1346 = vmatprep.mubr.bf16.mxu1 %v3862_v0 }
  0xfc   : > { %1234 = vmatmul.mubr.bf16.gmra.mrb[56].mxu0 %v4134_v10 }
  0xfd   : > { %1243 = vmatprep.mubr.bf16.mxu0 %v3862_v0 }
  0xfe   : > { %1347 = vmatmul.mubr.bf16.gmra.mrb[56].mxu1 %v4134_v10 }
  0xff   : > { %1356 = vmatprep.mubr.bf16.mxu1 %v3862_v0 }
 0x104   : > { %1244 = vmatmul.mubr.bf16.gmra.mrb[60].mxu0 %v4141_v11 }
 0x105   : > { %1399 = vmatprep.mubr.bf16.mxu0 %v3862_v0 }
 0x106   : > { %1357 = vmatmul.mubr.bf16.gmra.mrb[60].mxu1 %v4141_v11 }
 0x107   : > { %1512 = vmatprep.mubr.bf16.mxu1 %v3862_v0 }
 0x10c   : > { %1400 = vmatmul.mubr.bf16.vlgmr.msra.gmra.mrb[64].mxu0 %v4092_v34 }
 0x10d   : > { %1409 = vmatprep.mubr.bf16.mxu0 %v3862_v0 }
 0x10e   : > { %1513 = vmatmul.mubr.bf16.vlgmr.msra.gmra.mrb[64].mxu1 %v4092_v34  ;;  %v3219_v34 = vld [vmem:[#allocation7 + $0x8] sm:$0xff]  }
 0x10f   : > { %1522 = vmatprep.mubr.bf16.mxu1 %v3862_v0  ;;  %3424 = vmatpush3.bf16.msra.mxu1 %v3124_v45 }
 0x110   : > { %3425 = vmatprep.subr.bf16.mxu1 %v3863_v44 }
 0x113   : > { %3427 = vmatpush3.bf16.msra.mxu1 %v3219_v34 }
 0x114   : > { %1410 = vmatmul.mubr.bf16.gmra.mrb[68].mxu0 %v4098_v41  ;;  %3428 = vmatprep.subr.bf16.mxu1 %v3863_v44 }
 0x115   : > { %1419 = vmatprep.mubr.bf16.mxu0 %v3862_v0 }
 0x116   : > { %1523 = vmatmul.mubr.bf16.gmra.mrb[68].mxu1 %v4098_v41  ;;  %v3220_v41 = vld [vmem:[#allocation7 + $0x10] sm:$0xff]  }
 0x117   : > { %1532 = vmatprep.mubr.bf16.mxu1 %v3862_v0  ;;  %3430 = vmatpush3.bf16.msra.mxu1 %v3220_v41  ;;  %v3232_v41 = vld [vmem:[#allocation7 + $0x70] sm:$0xff]  }
 0x118   : > { %3431 = vmatprep.subr.bf16.mxu1 %v3863_v44 }
 0x11b   : > { %3433 = vmatpush3.bf16.msra.mxu1 %v3221_v46 }
 0x11c   : > { %1420 = vmatmul.mubr.bf16.gmra.mrb[72].mxu0 %v4106_v52  ;;  %3434 = vmatprep.subr.bf16.mxu1 %v3863_v44 }
 0x11d   : > { %1429 = vmatprep.mubr.bf16.mxu0 %v3862_v0 }
 0x11e   : > { %1533 = vmatmul.mubr.bf16.gmra.mrb[72].mxu1 %v4106_v52  ;;  %v3226_v52 = vld [vmem:[#allocation7 + $0x40] sm:$0xff]  }
 0x11f   : > { %1542 = vmatprep.mubr.bf16.mxu1 %v3862_v0  ;;  %3436 = vmatpush3.bf16.msra.mxu1 %v3222_v47 }
 0x120   : > { %3437 = vmatprep.subr.bf16.mxu1 %v3863_v44  ;;  %3400 = vmatpush3.bf16.msra.mxu0 %v3226_v52 }
 0x121   : > { %3401 = vmatprep.subr.bf16.mxu0 %v3863_v44 }
 0x123   : > { %3439 = vmatpush3.bf16.msra.mxu1 %v3223_v48 }
 0x124   : > { %1430 = vmatmul.mubr.bf16.gmra.mrb[76].mxu0 %v4113_v61  ;;  %3440 = vmatprep.subr.bf16.mxu1 %v3863_v44 }
 0x125   : > { %1439 = vmatprep.mubr.bf16.mxu0 %v3862_v0  ;;  %3403 = vmatpush3.bf16.msra.mxu0 %v3227_v53 }
 0x126   : > { %1543 = vmatmul.mubr.bf16.gmra.mrb[76].mxu1 %v4113_v61  ;;  %3404 = vmatprep.subr.bf16.mxu0 %v3863_v44 }
 0x127   : > { %1552 = vmatprep.mubr.bf16.mxu1 %v3862_v0  ;;  %3442 = vmatpush3.bf16.msra.mxu1 %v3224_v49 }
 0x128   : > { %3443 = vmatprep.subr.bf16.mxu1 %v3863_v44 }
 0x129   : > { %3406 = vmatpush3.bf16.msra.mxu0 %v3228_v57 }
 0x12a   : > { %3407 = vmatprep.subr.bf16.mxu0 %v3863_v44 }
 0x12b   : > { %3445 = vmatpush3.bf16.msra.mxu1 %v3225_v50 }
 0x12c   : > { %1440 = vmatmul.mubr.bf16.gmra.mrb[80].mxu0 %v4120_v7 }
 0x12d   : > { %1449 = vmatprep.mubr.bf16.mxu0 %v3862_v0 }
 0x12e   : > { %1553 = vmatmul.mubr.bf16.gmra.mrb[80].mxu1 %v4120_v7  ;;  %v3229_v7 = vld [vmem:[#allocation7 + $0x58] sm:$0xff]  }
 0x12f   : > { %1562 = vmatprep.mubr.bf16.mxu1 %v3862_v0  ;;  %3409 = vmatpush3.bf16.msra.mxu0 %v3229_v7 }
 0x130   : > { %3410 = vmatprep.subr.bf16.mxu0 %v3863_v44 }
 0x133   : > { %3412 = vmatpush3.bf16.msra.mxu0 %v3230_v19 }
 0x134   : > { %1450 = vmatmul.mubr.bf16.gmra.mrb[84].mxu0 %v4127_v9  ;;  %3413 = vmatprep.subr.bf16.mxu0 %v3863_v44 }
 0x135   : > { %1459 = vmatprep.mubr.bf16.mxu0 %v3862_v0 }
 0x136   : > { %1563 = vmatmul.mubr.bf16.gmra.mrb[84].mxu1 %v4127_v9 }
 0x137   : > { %1572 = vmatprep.mubr.bf16.mxu1 %v3862_v0  ;;  %3415 = vmatpush3.bf16.msra.mxu0 %v3231_v31 }
 0x138   : > { %3416 = vmatprep.subr.bf16.mxu0 %v3863_v44 }
 0x13b   : > { %3418 = vmatpush3.bf16.msra.mxu0 %v3232_v41 }
 0x13c   : > { %1460 = vmatmul.mubr.bf16.gmra.mrb[88].mxu0 %v4134_v10  ;;  %3419 = vmatprep.subr.bf16.mxu0 %v3863_v44 }
 0x13d   : > { %1469 = vmatprep.mubr.bf16.mxu0 %v3862_v0 }
 0x13e   : > { %1573 = vmatmul.mubr.bf16.gmra.mrb[88].mxu1 %v4134_v10 }
 0x13f   : > { %1582 = vmatprep.mubr.bf16.mxu1 %v3862_v0 }
 0x144   : > { %1470 = vmatmul.mubr.bf16.gmra.mrb[92].mxu0 %v4141_v11 }
 0x145   : > { %3325 = vmatprep.mubr.msk.f32.mxu0 %vm3864_vm0, %v3865_v51 }
 0x146   : > { %1583 = vmatmul.mubr.bf16.gmra.mrb[92].mxu1 %v4141_v11 }
 0x147   : > { %3360 = vmatprep.mubr.msk.f32.mxu1 %vm3864_vm0, %v3865_v51 }
 0x15f   : > { %v949_v54 = vpop.f32.mrb[0].mxu0  ;;  %v1062_v56 = vpop.f32.mrb[0].mxu1 }
 0x160   : > { %v951_v0 = vpop.f32.mrb[1].mxu0  ;;  %v1683_v58 = vrot.slane %v1062_v56, 2  ;;  %v4224_v60 = vpop.f32.mrb[1].mxu1 }
 0x161   : > { %v953_v55 = vpop.f32.mrb[2].mxu0  ;;  %v1610_v61 = vrot.slane %v951_v0, 1  ;;  %v1066_v63 = vpop.f32.mrb[2].mxu1 }
 0x162   : > { %v955_v59 = vpop.f32.mrb[3].mxu0  ;;  %v1684_v1 = vrot.slane %v1066_v63, 2  ;;  %v4227_v2 = vpop.f32.mrb[3].mxu1 }
 0x163   : > { %v1611_v62 = vrot.slane %v955_v59, 1 }
 0x164   : > { %v1685_v6 = vsel %vm1682_vm2, %v1683_v58, %v1684_v1  ;;  %v3233_v58 = vld [vmem:[#allocation7 + $0x78] sm:$0xff]  }
 0x165   : > { %v1612_v3 = vsel %vm1609_vm1, %v1610_v61, %v1611_v62  ;;  %v1651_v4 = vadd.f32 %v1611_v62, %v953_v55  ;;  %3421 = vmatpush3.bf16.msra.mxu0 %v3233_v58 }
 0x166   : > { %v1650_v5 = vadd.f32 %v1612_v3, %v949_v54  ;;  %3446 = vmatprep.subr.bf16.mxu0 %v3863_v44 }
 0x167   : > { %v1724_v8 = vadd.f32 %v1684_v1, %v1651_v4  ;;  %v959_v9 = vpop.f32.mrb[4].mxu0  ;;  %v1072_v14 = vpop.f32.mrb[4].mxu1 }
 0x168   : > { %v1723_v10 = vadd.f32 %v1685_v6, %v1650_v5  ;;  %v961_v11 = vpop.f32.mrb[5].mxu0  ;;  %v1686_v16 = vrot.slane %v1072_v14, 2  ;;  %v4233_v18 = vpop.f32.mrb[5].mxu1 }
 0x169   : > { %v1739_v12 = vsel %vm1682_vm2, %v1724_v8, -inf  ;;  %v963_v13 = vpop.f32.mrb[6].mxu0  ;;  %v1613_v20 = vrot.slane %v961_v11, 1  ;;  %v1076_v22 = vpop.f32.mrb[6].mxu1 }
 0x16a   : > { %v1740_v15 = vmax.f32 %v1723_v10, %v1739_v12  ;;  %v965_v17 = vpop.f32.mrb[7].mxu0  ;;  %v1687_v24 = vrot.slane %v1076_v22, 2  ;;  %v4235_v25 = vpop.f32.mrb[7].mxu1 }
 0x16b   : > { %v1614_v21 = vrot.slane %v965_v17, 1 }
 0x16c   : > { %v1741_v23 = vrot.slane %v1740_v15, 4  ;;  %v1688_v30 = vsel %vm1682_vm2, %v1686_v16, %v1687_v24  ;;  %v4256_v16 = vld [vmem:[%s4550_s2] ss:$0 sm:$0xff] }
 0x16d   : > { %v1615_v26 = vsel %vm1609_vm1, %v1613_v20, %v1614_v21  ;;  %v1653_v27 = vadd.f32 %v1614_v21, %v963_v13 }
 0x16e   : > { %v1742_v28 = vmax.f32 %v1740_v15, %v1741_v23  ;;  %v1652_v29 = vadd.f32 %v1615_v26, %v959_v9 }
 0x16f   : > { %v1726_v32 = vadd.f32 %v1687_v24, %v1653_v27  ;;  %v969_v33 = vpop.f32.mrb[8].mxu0 }
 0x170   : > { %v1743_v35 = vrot.slane %v1742_v28, 2  ;;  %v1725_v36 = vadd.f32 %v1688_v30, %v1652_v29  ;;  %v971_v37 = vpop.f32.mrb[9].mxu0 }
 0x171   : > { %v1747_v38 = vsel %vm1682_vm2, %v1726_v32, -inf  ;;  %v973_v39 = vpop.f32.mrb[10].mxu0  ;;  %v1082_v40 = vpop.f32.mrb[8].mxu1  ;;  %v1616_v47 = vrot.slane %v971_v37, 1 }
 0x172   : > { %v1748_v42 = vmax.f32 %v1725_v36, %v1747_v38  ;;  %v1689_v43 = vrot.slane %v1082_v40, 2  ;;  %v975_v45 = vpop.f32.mrb[11].mxu0  ;;  %v4242_v34 = vpop.f32.mrb[9].mxu1  ;;  %v1744_v46 = vmax.f32 %v1742_v28, %v1743_v35 }
 0x173   : > { %v1617_v48 = vrot.slane %v975_v45, 1  ;;  %v1086_v49 = vpop.f32.mrb[10].mxu1 }
 0x174   : > { %v1749_v50 = vrot.slane %v1748_v42, 4  ;;  %v1690_v52 = vrot.slane %v1086_v49, 2  ;;  %v4244_v53 = vpop.f32.mrb[11].mxu1  ;;  %v1745_v59 = vrot.slane %v1744_v46, 1 }
 0x175   : > { %v1618_v54 = vsel %vm1609_vm1, %v1616_v47, %v1617_v48  ;;  %v1655_v0 = vadd.f32 %v1617_v48, %v973_v39 }
 0x176   : > { %v1750_v55 = vmax.f32 %v1748_v42, %v1749_v50  ;;  %v1654_v56 = vadd.f32 %v1618_v54, %v969_v33  ;;  %v1691_v57 = vsel %vm1682_vm2, %v1689_v43, %v1690_v52  ;;  %v1746_v12 = vmax.f32 %v1744_v46, %v1745_v59 }
 0x177   : > { %v1728_v61 = vadd.f32 %v1690_v52, %v1655_v0  ;;  %v979_v62 = vpop.f32.mrb[12].mxu0 }
 0x178   : > { %v1751_v63 = vrot.slane %v1750_v55, 2  ;;  %v1727_v1 = vadd.f32 %v1691_v57, %v1654_v56  ;;  %v981_v3 = vpop.f32.mrb[13].mxu0  ;;  %v1808_v29 = vadd.f32 %v4256_v16, %v1746_v12 }
 0x179   : > { %v1755_v4 = vsel %vm1682_vm2, %v1728_v61, -inf  ;;  %v983_v5 = vpop.f32.mrb[14].mxu0  ;;  %v1092_v6 = vpop.f32.mrb[12].mxu1  ;;  %v1619_v13 = vrot.slane %v981_v3, 1 }
 0x17a   : > { %v1752_v7 = vmax.f32 %v1750_v55, %v1751_v63  ;;  %v1756_v8 = vmax.f32 %v1727_v1, %v1755_v4  ;;  %v1692_v9 = vrot.slane %v1092_v6, 2  ;;  %v985_v10 = vpop.f32.mrb[15].mxu0  ;;  %v4251_v11 = vpop.f32.mrb[13].mxu1  ;;  %v1816_v46 = vmax.f32 %v1808_v29, 0.0 }
 0x17b   : > { %v1620_v14 = vrot.slane %v985_v10, 1  ;;  %v1096_v15 = vpop.f32.mrb[14].mxu1 }
 0x17c   : > { %v1753_v17 = vrot.slane %v1752_v7, 1  ;;  %v1757_v19 = vrot.slane %v1756_v8, 4  ;;  %v1693_v20 = vrot.slane %v1096_v15, 2  ;;  %v4258_v21 = vpop.f32.mrb[15].mxu1 }
 0x17d   : > { %v1621_v22 = vsel %vm1609_vm1, %v1619_v13, %v1620_v14  ;;  %v1657_v23 = vadd.f32 %v1620_v14, %v983_v5 }
 0x17e   : > { %v1754_v24 = vmax.f32 %v1752_v7, %v1753_v17  ;;  %v1758_v26 = vmax.f32 %v1756_v8, %v1757_v19  ;;  %v1656_v27 = vadd.f32 %v1621_v22, %v979_v62  ;;  %v1694_v28 = vsel %vm1682_vm2, %v1692_v9, %v1693_v20 }
 0x17f   : > { %v1730_v30 = vadd.f32 %v1693_v20, %v1657_v23  ;;  %v989_v31 = vpop.f32.mrb[16].mxu0 }
 0x180   : > { %v1809_v32 = vadd.f32 %v4256_v16, %v1754_v24  ;;  %v1759_v33 = vrot.slane %v1758_v26, 2  ;;  %v1729_v35 = vadd.f32 %v1694_v28, %v1656_v27  ;;  %v991_v36 = vpop.f32.mrb[17].mxu0 }
 0x181   : > { %v1763_v37 = vsel %vm1682_vm2, %v1730_v30, -inf  ;;  %v993_v38 = vpop.f32.mrb[18].mxu0  ;;  %v1102_v39 = vpop.f32.mrb[16].mxu1  ;;  %v1622_v47 = vrot.slane %v991_v36, 1 }
 0x182   : > { %v1817_v40 = vmax.f32 %v1809_v32, 0.0  ;;  %v1760_v42 = vmax.f32 %v1758_v26, %v1759_v33  ;;  %v1764_v43 = vmax.f32 %v1729_v35, %v1763_v37  ;;  %v995_v45 = vpop.f32.mrb[19].mxu0  ;;  %v4265_v41 = vpop.f32.mrb[17].mxu1  ;;  %v1695_v48 = vrot.slane %v1102_v39, 2 }
 0x183   : > { %v1623_v49 = vrot.slane %v995_v45, 1  ;;  %v1106_v50 = vpop.f32.mrb[18].mxu1 }
 0x184   : > { %v2298_v52 = vrot.slane %v1817_v40, 7  ;;  %v1761_v54 = vrot.slane %v1760_v42, 1  ;;  %v1765_v0 = vrot.slane %v1764_v43, 4  ;;  %v1696_v55 = vrot.slane %v1106_v50, 2  ;;  %v4267_v56 = vpop.f32.mrb[19].mxu1 }
 0x185   : > { %v1624_v57 = vsel %vm1609_vm1, %v1622_v47, %v1623_v49  ;;  %v1659_v58 = vadd.f32 %v1623_v49, %v993_v38 }
 0x186   : > { %v2299_v59 = vsel %vm2199_vm3, %v2298_v52, %v1816_v46  ;;  %v1762_v61 = vmax.f32 %v1760_v42, %v1761_v54  ;;  %v1766_v62 = vmax.f32 %v1764_v43, %v1765_v0  ;;  %v1658_v63 = vadd.f32 %v1624_v57, %v989_v31 }
 0x187   : > { %v1697_v1 = vsel %vm1682_vm2, %v1695_v48, %v1696_v55  ;;  %v1732_v3 = vadd.f32 %v1696_v55, %v1659_v58  ;;  %v999_v4 = vpop.f32.mrb[20].mxu0 }
 0x188   : > { %v1810_v5 = vadd.f32 %v4256_v16, %v1762_v61  ;;  %v1767_v6 = vrot.slane %v1766_v62, 2  ;;  %v1731_v7 = vadd.f32 %v1697_v1, %v1658_v63  ;;  %v1001_v8 = vpop.f32.mrb[21].mxu0 }
 0x189   : > { %v1771_v9 = vsel %vm1682_vm2, %v1732_v3, -inf  ;;  %v1003_v10 = vpop.f32.mrb[22].mxu0  ;;  %v1112_v12 = vpop.f32.mrb[20].mxu1  ;;  %v1625_v22 = vrot.slane %v1001_v8, 1 }
 0x18a   : > { %v1818_v13 = vmax.f32 %v1810_v5, 0.0  ;;  %v1768_v14 = vmax.f32 %v1766_v62, %v1767_v6  ;;  %v1772_v15 = vmax.f32 %v1731_v7, %v1771_v9  ;;  %v1698_v17 = vrot.slane %v1112_v12, 2  ;;  %v1005_v19 = vpop.f32.mrb[23].mxu0  ;;  %v4274_v20 = vpop.f32.mrb[21].mxu1 }
 0x18b   : > { %v1626_v23 = vrot.slane %v1005_v19, 1  ;;  %v1116_v24 = vpop.f32.mrb[22].mxu1 }
 0x18c   : > { %v2300_v26 = vrot.slane %v1818_v13, 6  ;;  %v1769_v27 = vrot.slane %v1768_v14, 1  ;;  %v1773_v28 = vrot.slane %v1772_v15, 4  ;;  %v1699_v29 = vrot.slane %v1116_v24, 2  ;;  %v4276_v30 = vpop.f32.mrb[23].mxu1 }
 0x18d   : > { %v1627_v31 = vsel %vm1609_vm1, %v1625_v22, %v1626_v23  ;;  %v1661_v32 = vadd.f32 %v1626_v23, %v1003_v10 }
 0x18e   : > { %v1770_v33 = vmax.f32 %v1768_v14, %v1769_v27  ;;  %v1774_v35 = vmax.f32 %v1772_v15, %v1773_v28  ;;  %v1660_v36 = vadd.f32 %v1627_v31, %v999_v4  ;;  %v1700_v37 = vsel %vm1682_vm2, %v1698_v17, %v1699_v29 }
 0x18f   : > { %v1734_v38 = vadd.f32 %v1699_v29, %v1661_v32  ;;  %v1009_v39 = vpop.f32.mrb[24].mxu0  ;;  %v2301_v40 = vsel %vm2202_vm4, %v2300_v26, %v2299_v59 }
 0x190   : > { %v1811_v42 = vadd.f32 %v4256_v16, %v1770_v33  ;;  %v1775_v43 = vrot.slane %v1774_v35, 2  ;;  %v1733_v45 = vadd.f32 %v1700_v37, %v1660_v36  ;;  %v1011_v46 = vpop.f32.mrb[25].mxu0 }
 0x191   : > { %v1779_v47 = vsel %vm1682_vm2, %v1734_v38, -inf  ;;  %v1013_v48 = vpop.f32.mrb[26].mxu0  ;;  %v1122_v49 = vpop.f32.mrb[24].mxu1  ;;  %v1628_v58 = vrot.slane %v1011_v46, 1 }
 0x192   : > { %v1819_v50 = vmax.f32 %v1811_v42, 0.0  ;;  %v1776_v52 = vmax.f32 %v1774_v35, %v1775_v43  ;;  %v1780_v54 = vmax.f32 %v1733_v45, %v1779_v47  ;;  %v1701_v0 = vrot.slane %v1122_v49, 2  ;;  %v1015_v55 = vpop.f32.mrb[27].mxu0  ;;  %v4283_v57 = vpop.f32.mrb[25].mxu1 }
 0x193   : > { %v1629_v61 = vrot.slane %v1015_v55, 1  ;;  %v1126_v62 = vpop.f32.mrb[26].mxu1 }
 0x194   : > { %v2302_v59 = vrot.slane %v1819_v50, 5  ;;  %v1777_v63 = vrot.slane %v1776_v52, 1  ;;  %v1781_v1 = vrot.slane %v1780_v54, 4  ;;  %v1702_v3 = vrot.slane %v1126_v62, 2  ;;  %v4285_v4 = vpop.f32.mrb[27].mxu1 }
 0x195   : > { %v1630_v5 = vsel %vm1609_vm1, %v1628_v58, %v1629_v61  ;;  %v1663_v6 = vadd.f32 %v1629_v61, %v1013_v48 }
 0x196   : > { %v1778_v7 = vmax.f32 %v1776_v52, %v1777_v63  ;;  %v1782_v8 = vmax.f32 %v1780_v54, %v1781_v1  ;;  %v1662_v9 = vadd.f32 %v1630_v5, %v1009_v39  ;;  %v1703_v10 = vsel %vm1682_vm2, %v1701_v0, %v1702_v3 }
 0x197   : > { %v1736_v12 = vadd.f32 %v1702_v3, %v1663_v6  ;;  %v1019_v13 = vpop.f32.mrb[28].mxu0  ;;  %v2303_v14 = vsel %vm2205_vm5, %v2302_v59, %v2301_v40 }
 0x198   : > { %v1812_v15 = vadd.f32 %v4256_v16, %v1778_v7  ;;  %v1783_v17 = vrot.slane %v1782_v8, 2  ;;  %v1735_v19 = vadd.f32 %v1703_v10, %v1662_v9  ;;  %v1021_v22 = vpop.f32.mrb[29].mxu0 }
 0x199   : > { %v1787_v23 = vsel %vm1682_vm2, %v1736_v12, -inf  ;;  %v1023_v24 = vpop.f32.mrb[30].mxu0  ;;  %v1132_v26 = vpop.f32.mrb[28].mxu1  ;;  %v1631_v35 = vrot.slane %v1021_v22, 1 }
 0x19a   : > { %v1820_v27 = vmax.f32 %v1812_v15, 0.0  ;;  %v1784_v28 = vmax.f32 %v1782_v8, %v1783_v17  ;;  %v1788_v29 = vmax.f32 %v1735_v19, %v1787_v23  ;;  %v1704_v31 = vrot.slane %v1132_v26, 2  ;;  %v1025_v32 = vpop.f32.mrb[31].mxu0  ;;  %v4292_v33 = vpop.f32.mrb[29].mxu1 }
 0x19b   : > { %v1632_v36 = vrot.slane %v1025_v32, 1  ;;  %v1136_v37 = vpop.f32.mrb[30].mxu1 }
 0x19c   : > { %v2304_v38 = vrot.slane %v1820_v27, 4  ;;  %v1785_v39 = vrot.slane %v1784_v28, 1  ;;  %v1789_v40 = vrot.slane %v1788_v29, 4  ;;  %v1705_v42 = vrot.slane %v1136_v37, 2  ;;  %v4294_v43 = vpop.f32.mrb[31].mxu1 }
 0x19d   : > { %v1633_v45 = vsel %vm1609_vm1, %v1631_v35, %v1632_v36  ;;  %v1665_v46 = vadd.f32 %v1632_v36, %v1023_v24 }
 0x19e   : > { %v1786_v47 = vmax.f32 %v1784_v28, %v1785_v39  ;;  %v1790_v48 = vmax.f32 %v1788_v29, %v1789_v40  ;;  %v1664_v49 = vadd.f32 %v1633_v45, %v1019_v13  ;;  %v1706_v50 = vsel %vm1682_vm2, %v1704_v31, %v1705_v42 }
 0x19f   : > { %v1738_v52 = vadd.f32 %v1705_v42, %v1665_v46  ;;  %v1175_v54 = vpop.f32.mrb[32].mxu0  ;;  %v2305_v0 = vsel %vm2208_vm6, %v2304_v38, %v2303_v14 }
 0x1a0   : > { %v1813_v55 = vadd.f32 %v4256_v16, %v1786_v47  ;;  %v1791_v58 = vrot.slane %v1790_v48, 2  ;;  %v1737_v61 = vadd.f32 %v1706_v50, %v1664_v49  ;;  %v1177_v62 = vpop.f32.mrb[33].mxu0  ;;  %v1872_v63 = vrot.slane %v1175_v54, 1 }
 0x1a1   : > { %v1795_v59 = vsel %vm1682_vm2, %v1738_v52, -inf  ;;  %v1179_v1 = vpop.f32.mrb[34].mxu0  ;;  %v1288_v3 = vpop.f32.mrb[32].mxu1  ;;  %v1944_v12 = vrot.slane %v1177_v62, 2 }
 0x1a2   : > { %v1821_v5 = vmax.f32 %v1813_v55, 0.0  ;;  %v1792_v6 = vmax.f32 %v1790_v48, %v1791_v58  ;;  %v1796_v7 = vmax.f32 %v1737_v61, %v1795_v59  ;;  %v1873_v8 = vrot.slane %v1179_v1, 1  ;;  %v1181_v9 = vpop.f32.mrb[35].mxu0  ;;  %v4301_v10 = vpop.f32.mrb[33].mxu1 }
 0x1a3   : > { %v2017_v13 = vrot.slane %v1288_v3, 3  ;;  %v1945_v14 = vrot.slane %v1181_v9, 2  ;;  %v1292_v15 = vpop.f32.mrb[34].mxu1 }
 0x1a4   : > { %v2306_v17 = vrot.slane %v1821_v5, 3  ;;  %v1793_v19 = vrot.slane %v1792_v6, 1  ;;  %v1797_v22 = vrot.slane %v1796_v7, 4  ;;  %v1874_v23 = vsel %vm1609_vm1, %v1872_v63, %v1873_v8  ;;  %v4304_v24 = vpop.f32.mrb[35].mxu1 }
 0x1a5   : > { %v1912_v26 = vadd.f32 %v1874_v23, %v4224_v60  ;;  %v1913_v27 = vadd.f32 %v1873_v8, %v4227_v2  ;;  %v1946_v28 = vsel %vm1682_vm2, %v1944_v12, %v1945_v14  ;;  %v2018_v29 = vrot.slane %v1292_v15, 3 }
 0x1a6   : > { %v1794_v31 = vmax.f32 %v1792_v6, %v1793_v19  ;;  %v1798_v32 = vmax.f32 %v1796_v7, %v1797_v22  ;;  %v2307_v35 = vsel %vm2211_vm8, %v2306_v17, %v2305_v0 }
 0x1a7   : > { %v1984_v36 = vadd.f32 %v1946_v28, %v1912_v26  ;;  %v1985_v37 = vadd.f32 %v1945_v14, %v1913_v27  ;;  %v2019_v38 = vsel %vm2016_vm7, %v2017_v13, %v2018_v29  ;;  %v1185_v39 = vpop.f32.mrb[36].mxu0 }
 0x1a8   : > { %v1799_v40 = vrot.slane %v1798_v32, 2  ;;  %v1187_v42 = vpop.f32.mrb[37].mxu0  ;;  %v1814_v45 = vadd.f32 %v4256_v16, %v1794_v31  ;;  %v1875_v49 = vrot.slane %v1185_v39, 1 }
 0x1a9   : > { %v2057_v46 = vadd.f32 %v2019_v38, %v1984_v36  ;;  %v2058_v60 = vadd.f32 %v2018_v29, %v1985_v37  ;;  %v1189_v47 = vpop.f32.mrb[38].mxu0  ;;  %v1298_v2 = vpop.f32.mrb[36].mxu1  ;;  %v1947_v58 = vrot.slane %v1187_v42, 2 }
 0x1aa   : > { %v1800_v48 = vmax.f32 %v1798_v32, %v1799_v40  ;;  %v1876_v50 = vrot.slane %v1189_v47, 1  ;;  %v1191_v52 = vpop.f32.mrb[39].mxu0  ;;  %v4312_v54 = vpop.f32.mrb[37].mxu1  ;;  %v1822_v0 = vmax.f32 %v1814_v45, 0.0  ;;  %v2020_v61 = vrot.slane %v1298_v2, 3 }
 0x1ab   : > { %v2073_v55 = vsel %vm2016_vm7, %v2058_v60, -inf  ;;  %v1948_v62 = vrot.slane %v1191_v52, 2  ;;  %v1302_v59 = vpop.f32.mrb[38].mxu1 }
 0x1ac   : > { %v1801_v63 = vrot.slane %v1800_v48, 1  ;;  %v2074_v1 = vmax.f32 %v2057_v46, %v2073_v55  ;;  %v1877_v3 = vsel %vm1609_vm1, %v1875_v49, %v1876_v50  ;;  %v1915_v5 = vadd.f32 %v1876_v50, %v4235_v25  ;;  %v4317_v6 = vpop.f32.mrb[39].mxu1 }
 0x1ad   : > { %v1914_v7 = vadd.f32 %v1877_v3, %v4233_v18  ;;  %v1949_v8 = vsel %vm1682_vm2, %v1947_v58, %v1948_v62  ;;  %v2021_v9 = vrot.slane %v1302_v59, 3  ;;  %v2308_v12 = vrot.slane %v1822_v0, 2 }
 0x1ae   : > { %v1802_v13 = vmax.f32 %v1800_v48, %v1801_v63  ;;  %v2075_v14 = vrot.slane %v2074_v1, 4  ;;  %v1987_v15 = vadd.f32 %v1948_v62, %v1915_v5 }
 0x1af   : > { %v1986_v17 = vadd.f32 %v1949_v8, %v1914_v7  ;;  %v2022_v19 = vsel %vm2016_vm7, %v2020_v61, %v2021_v9  ;;  %v1195_v22 = vpop.f32.mrb[40].mxu0  ;;  %v2309_v23 = vsel %vm2214_vm9, %v2308_v12, %v2307_v35 }
 0x1b0   : > { %v2076_v26 = vmax.f32 %v2074_v1, %v2075_v14  ;;  %v2060_v27 = vadd.f32 %v2021_v9, %v1987_v15  ;;  %v1197_v25 = vpop.f32.mrb[41].mxu0  ;;  %v1815_v28 = vadd.f32 %v4256_v16, %v1802_v13  ;;  %v1878_v18 = vrot.slane %v1195_v22, 1 }
 0x1b1   : > { %v2059_v29 = vadd.f32 %v2022_v19, %v1986_v17  ;;  %v1199_v31 = vpop.f32.mrb[42].mxu0  ;;  %v1308_v32 = vpop.f32.mrb[40].mxu1  ;;  %v1950_v35 = vrot.slane %v1197_v25, 2 }
 0x1b2   : > { %v2077_v36 = vrot.slane %v2076_v26, 2  ;;  %v2081_v37 = vsel %vm2016_vm7, %v2060_v27, -inf  ;;  %v1879_v38 = vrot.slane %v1199_v31, 1  ;;  %v2023_v39 = vrot.slane %v1308_v32, 3  ;;  %v1201_v40 = vpop.f32.mrb[43].mxu0  ;;  %v4325_v42 = vpop.f32.mrb[41].mxu1 }
 0x1b3   : > { %v2082_v45 = vmax.f32 %v2059_v29, %v2081_v37  ;;  %v1951_v46 = vrot.slane %v1201_v40, 2  ;;  %v1312_v60 = vpop.f32.mrb[42].mxu1  ;;  %v1823_v47 = vmax.f32 %v1815_v28, 0.0 }
 0x1b4   : > { %v2078_v2 = vmax.f32 %v2076_v26, %v2077_v36  ;;  %v1880_v16 = vsel %vm1609_vm1, %v1878_v18, %v1879_v38  ;;  %v1917_v48 = vadd.f32 %v1879_v38, %v4244_v53  ;;  %v2024_v49 = vrot.slane %v1312_v60, 3  ;;  %v4329_v50 = vpop.f32.mrb[43].mxu1 }
 0x1b5   : > { %v2083_v52 = vrot.slane %v2082_v45, 4  ;;  %v1916_v0 = vadd.f32 %v1880_v16, %v4242_v34  ;;  %v1952_v55 = vsel %vm1682_vm2, %v1950_v35, %v1951_v46  ;;  %v2310_v58 = vrot.slane %v1823_v47, 1  ;;  %v4338_v34 = vld [vmem:[%s4550_s2 + $0x1] ss:$0 sm:$0xff] }
 0x1b6   : > { %v2079_v61 = vrot.slane %v2078_v2, 1  ;;  %v1989_v62 = vadd.f32 %v1951_v46, %v1917_v48  ;;  %v2025_v59 = vsel %vm2016_vm7, %v2023_v39, %v2024_v49 }
 0x1b7   : > { %v2084_v63 = vmax.f32 %v2082_v45, %v2083_v52  ;;  %v1988_v1 = vadd.f32 %v1952_v55, %v1916_v0  ;;  %v1205_v3 = vpop.f32.mrb[44].mxu0  ;;  %v2311_v5 = vsel %vm2217_vm10, %v2310_v58, %v2309_v23 }
 0x1b8   : > { %v2080_v7 = vmax.f32 %v2078_v2, %v2079_v61  ;;  %v2062_v53 = vadd.f32 %v2024_v49, %v1989_v62  ;;  %3361 = vmatmul.mubr.f32.vlgmr.msra.gmra.mrb[96].mxu1 %v2311_v5  ;;  %v1207_v8 = vpop.f32.mrb[45].mxu0  ;;  %v1881_v17 = vrot.slane %v1205_v3, 1 }
 0x1b9   : > { %v2085_v9 = vrot.slane %v2084_v63, 2  ;;  %v2061_v12 = vadd.f32 %v2025_v59, %v1988_v1  ;;  %v1209_v13 = vpop.f32.mrb[46].mxu0  ;;  %v1318_v14 = vpop.f32.mrb[44].mxu1  ;;  %v1953_v28 = vrot.slane %v1207_v8, 2 }
 0x1ba   : > { %v2089_v15 = vsel %vm2016_vm7, %v2062_v53, -inf  ;;  %v1882_v19 = vrot.slane %v1209_v13, 1  ;;  %v2026_v22 = vrot.slane %v1318_v14, 3  ;;  %v1211_v26 = vpop.f32.mrb[47].mxu0  ;;  %v4341_v23 = vpop.f32.mrb[45].mxu1  ;;  %v2142_v31 = vadd.f32 %v4338_v34, %v2080_v7 }
 0x1bb   : > { %v2086_v27 = vmax.f32 %v2084_v63, %v2085_v9  ;;  %v2090_v25 = vmax.f32 %v2061_v12, %v2089_v15  ;;  %v1954_v29 = vrot.slane %v1211_v26, 2  ;;  %v1322_v18 = vpop.f32.mrb[46].mxu1 }
 0x1bc   : > { %v1883_v32 = vsel %vm1609_vm1, %v1881_v17, %v1882_v19  ;;  %v1919_v36 = vadd.f32 %v1882_v19, %v4258_v21  ;;  %v2027_v37 = vrot.slane %v1322_v18, 3  ;;  %v4346_v38 = vpop.f32.mrb[47].mxu1  ;;  %v2150_v0 = vmax.f32 %v2142_v31, 0.0 }
 0x1bd   : > { %v2087_v39 = vrot.slane %v2086_v27, 1  ;;  %v2091_v40 = vrot.slane %v2090_v25, 4  ;;  %v1918_v45 = vadd.f32 %v1883_v32, %v4251_v11  ;;  %v1955_v35 = vsel %vm1682_vm2, %v1953_v28, %v1954_v29 }
 0x1be   : > { %v1991_v46 = vadd.f32 %v1954_v29, %v1919_v36  ;;  %v2028_v60 = vsel %vm2016_vm7, %v2026_v22, %v2027_v37 }
 0x1bf   : > { %v2088_v47 = vmax.f32 %v2086_v27, %v2087_v39  ;;  %v2092_v2 = vmax.f32 %v2090_v25, %v2091_v40  ;;  %v1990_v16 = vadd.f32 %v1955_v35, %v1918_v45  ;;  %v1215_v48 = vpop.f32.mrb[48].mxu0 }
 0x1c0   : > { %v2064_v49 = vadd.f32 %v2027_v37, %v1991_v46  ;;  %v1217_v52 = vpop.f32.mrb[49].mxu0  ;;  %v1884_v59 = vrot.slane %v1215_v48, 1 }
 0x1c1   : > { %v2143_v21 = vadd.f32 %v4338_v34, %v2088_v47  ;;  %v2093_v55 = vrot.slane %v2092_v2, 2  ;;  %v2063_v58 = vadd.f32 %v2028_v60, %v1990_v16  ;;  %v1219_v61 = vpop.f32.mrb[50].mxu0  ;;  %v1328_v62 = vpop.f32.mrb[48].mxu1  ;;  %v1956_v13 = vrot.slane %v1217_v52, 2 }
 0x1c2   : > { %v2097_v11 = vsel %vm2016_vm7, %v2064_v49, -inf  ;;  %v1885_v63 = vrot.slane %v1219_v61, 1  ;;  %v2029_v1 = vrot.slane %v1328_v62, 3  ;;  %v1221_v3 = vpop.f32.mrb[51].mxu0  ;;  %v4353_v5 = vpop.f32.mrb[49].mxu1 }
 0x1c3   : > { %v2151_v7 = vmax.f32 %v2143_v21, 0.0  ;;  %v2094_v53 = vmax.f32 %v2092_v2, %v2093_v55  ;;  %v2098_v8 = vmax.f32 %v2063_v58, %v2097_v11  ;;  %v1957_v9 = vrot.slane %v1221_v3, 2  ;;  %v1332_v12 = vpop.f32.mrb[50].mxu1 }
 0x1c4   : > { %v1886_v14 = vsel %vm1609_vm1, %v1884_v59, %v1885_v63  ;;  %v1921_v15 = vadd.f32 %v1885_v63, %v4267_v56  ;;  %v2030_v17 = vrot.slane %v1332_v12, 3  ;;  %v4357_v19 = vpop.f32.mrb[51].mxu1 }
 0x1c5   : > { %v2198_v22 = vrot.slane %v2151_v7, 7  ;;  %v2095_v26 = vrot.slane %v2094_v53, 1  ;;  %v2099_v27 = vrot.slane %v2098_v8, 4  ;;  %v1920_v25 = vadd.f32 %v1886_v14, %v4265_v41 }
 0x1c6   : > { %v1958_v28 = vsel %vm1682_vm2, %v1956_v13, %v1957_v9  ;;  %v1993_v29 = vadd.f32 %v1957_v9, %v1921_v15  ;;  %v2031_v18 = vsel %vm2016_vm7, %v2029_v1, %v2030_v17 }
 0x1c7   : > { %v2200_v31 = vsel %vm2199_vm3, %v2198_v22, %v2150_v0  ;;  %v2096_v32 = vmax.f32 %v2094_v53, %v2095_v26  ;;  %v2100_v36 = vmax.f32 %v2098_v8, %v2099_v27  ;;  %v1992_v37 = vadd.f32 %v1958_v28, %v1920_v25  ;;  %v1225_v39 = vpop.f32.mrb[52].mxu0 }
 0x1c8   : > { %v2066_v56 = vadd.f32 %v2030_v17, %v1993_v29  ;;  %v1227_v40 = vpop.f32.mrb[53].mxu0  ;;  %v1887_v2 = vrot.slane %v1225_v39, 1 }
 0x1c9   : > { %v2144_v45 = vadd.f32 %v4338_v34, %v2096_v32  ;;  %v2101_v35 = vrot.slane %v2100_v36, 2  ;;  %v2065_v46 = vadd.f32 %v2031_v18, %v1992_v37  ;;  %v1229_v60 = vpop.f32.mrb[54].mxu0  ;;  %v1338_v47 = vpop.f32.mrb[52].mxu1  ;;  %v1959_v62 = vrot.slane %v1227_v40, 2 }
 0x1ca   : > { %v2105_v41 = vsel %vm2016_vm7, %v2066_v56, -inf  ;;  %v1888_v16 = vrot.slane %v1229_v60, 1  ;;  %v2032_v48 = vrot.slane %v1338_v47, 3  ;;  %v1231_v49 = vpop.f32.mrb[55].mxu0  ;;  %v4365_v52 = vpop.f32.mrb[53].mxu1 }
 0x1cb   : > { %v2152_v0 = vmax.f32 %v2144_v45, 0.0  ;;  %v2102_v21 = vmax.f32 %v2100_v36, %v2101_v35  ;;  %v2106_v55 = vmax.f32 %v2065_v46, %v2105_v41  ;;  %v1960_v58 = vrot.slane %v1231_v49, 2  ;;  %v1342_v61 = vpop.f32.mrb[54].mxu1 }
 0x1cc   : > { %v1889_v11 = vsel %vm1609_vm1, %v1887_v2, %v1888_v16  ;;  %v1923_v59 = vadd.f32 %v1888_v16, %v4276_v30  ;;  %v2033_v63 = vrot.slane %v1342_v61, 3  ;;  %v4369_v1 = vpop.f32.mrb[55].mxu1 }
 0x1cd   : > { %v2201_v3 = vrot.slane %v2152_v0, 6  ;;  %v2103_v7 = vrot.slane %v2102_v21, 1  ;;  %v2107_v53 = vrot.slane %v2106_v55, 4  ;;  %v1922_v8 = vadd.f32 %v1889_v11, %v4274_v20 }
 0x1ce   : > { %v1961_v9 = vsel %vm1682_vm2, %v1959_v62, %v1960_v58  ;;  %v1995_v12 = vadd.f32 %v1960_v58, %v1923_v59  ;;  %v2034_v13 = vsel %vm2016_vm7, %v2032_v48, %v2033_v63 }
 0x1cf   : > { %v2104_v14 = vmax.f32 %v2102_v21, %v2103_v7  ;;  %v2108_v15 = vmax.f32 %v2106_v55, %v2107_v53  ;;  %v1994_v17 = vadd.f32 %v1961_v9, %v1922_v8  ;;  %v1235_v22 = vpop.f32.mrb[56].mxu0  ;;  %v2203_v26 = vsel %vm2202_vm4, %v2201_v3, %v2200_v31 }
 0x1d0   : > { %v2068_v30 = vadd.f32 %v2033_v63, %v1995_v12  ;;  %v1237_v27 = vpop.f32.mrb[57].mxu0  ;;  %v1890_v36 = vrot.slane %v1235_v22, 1 }
 0x1d1   : > { %v2145_v25 = vadd.f32 %v4338_v34, %v2104_v14  ;;  %v2109_v28 = vrot.slane %v2108_v15, 2  ;;  %v2067_v29 = vadd.f32 %v2034_v13, %v1994_v17  ;;  %v1239_v18 = vpop.f32.mrb[58].mxu0  ;;  %v1348_v32 = vpop.f32.mrb[56].mxu1  ;;  %v1962_v47 = vrot.slane %v1237_v27, 2 }
 0x1d2   : > { %v2113_v20 = vsel %vm2016_vm7, %v2068_v30, -inf  ;;  %v1891_v37 = vrot.slane %v1239_v18, 1  ;;  %v2035_v39 = vrot.slane %v1348_v32, 3  ;;  %v1241_v56 = vpop.f32.mrb[59].mxu0  ;;  %v4377_v40 = vpop.f32.mrb[57].mxu1 }
 0x1d3   : > { %v2153_v45 = vmax.f32 %v2145_v25, 0.0  ;;  %v2110_v35 = vmax.f32 %v2108_v15, %v2109_v28  ;;  %v2114_v46 = vmax.f32 %v2067_v29, %v2113_v20  ;;  %v1963_v31 = vrot.slane %v1241_v56, 2  ;;  %v1352_v60 = vpop.f32.mrb[58].mxu1 }
 0x1d4   : > { %v1892_v41 = vsel %vm1609_vm1, %v1890_v36, %v1891_v37  ;;  %v1925_v2 = vadd.f32 %v1891_v37, %v4285_v4  ;;  %v2036_v16 = vrot.slane %v1352_v60, 3  ;;  %v4381_v48 = vpop.f32.mrb[59].mxu1 }
 0x1d5   : > { %v2204_v49 = vrot.slane %v2153_v45, 5  ;;  %v2111_v0 = vrot.slane %v2110_v35, 1  ;;  %v2115_v21 = vrot.slane %v2114_v46, 4  ;;  %v1924_v55 = vadd.f32 %v1892_v41, %v4283_v57 }
 0x1d6   : > { %v1964_v58 = vsel %vm1682_vm2, %v1962_v47, %v1963_v31  ;;  %v1997_v61 = vadd.f32 %v1963_v31, %v1925_v2  ;;  %v2037_v62 = vsel %vm2016_vm7, %v2035_v39, %v2036_v16 }
 0x1d7   : > { %v2112_v11 = vmax.f32 %v2110_v35, %v2111_v0  ;;  %v2116_v59 = vmax.f32 %v2114_v46, %v2115_v21  ;;  %v1996_v63 = vadd.f32 %v1964_v58, %v1924_v55  ;;  %v1245_v3 = vpop.f32.mrb[60].mxu0  ;;  %v2206_v7 = vsel %vm2205_vm5, %v2204_v49, %v2203_v26 }
 0x1d8   : > { %v2070_v4 = vadd.f32 %v2036_v16, %v1997_v61  ;;  %v1247_v53 = vpop.f32.mrb[61].mxu0  ;;  %v1893_v15 = vrot.slane %v1245_v3, 1 }
 0x1d9   : > { %v2146_v8 = vadd.f32 %v4338_v34, %v2112_v11  ;;  %v2117_v9 = vrot.slane %v2116_v59, 2  ;;  %v2069_v12 = vadd.f32 %v2037_v62, %v1996_v63  ;;  %v1249_v13 = vpop.f32.mrb[62].mxu0  ;;  %v1358_v14 = vpop.f32.mrb[60].mxu1  ;;  %v1965_v32 = vrot.slane %v1247_v53, 2 }
 0x1da   : > { %v2121_v57 = vsel %vm2016_vm7, %v2070_v4, -inf  ;;  %v1894_v17 = vrot.slane %v1249_v13, 1  ;;  %v2038_v22 = vrot.slane %v1358_v14, 3  ;;  %v1251_v30 = vpop.f32.mrb[63].mxu0  ;;  %v4389_v27 = vpop.f32.mrb[61].mxu1 }
 0x1db   : > { %v2154_v25 = vmax.f32 %v2146_v8, 0.0  ;;  %v2118_v28 = vmax.f32 %v2116_v59, %v2117_v9  ;;  %v2122_v29 = vmax.f32 %v2069_v12, %v2121_v57  ;;  %v1966_v26 = vrot.slane %v1251_v30, 2  ;;  %v1362_v18 = vpop.f32.mrb[62].mxu1 }
 0x1dc   : > { %v1895_v20 = vsel %vm1609_vm1, %v1893_v15, %v1894_v17  ;;  %v1927_v36 = vadd.f32 %v1894_v17, %v4294_v43  ;;  %v2039_v37 = vrot.slane %v1362_v18, 3  ;;  %v4393_v39 = vpop.f32.mrb[63].mxu1 }
 0x1dd   : > { %v2207_v56 = vrot.slane %v2154_v25, 4  ;;  %v2119_v45 = vrot.slane %v2118_v28, 1  ;;  %v2123_v35 = vrot.slane %v2122_v29, 4  ;;  %v1926_v46 = vadd.f32 %v1895_v20, %v4292_v33 }
 0x1de   : > { %v1967_v31 = vsel %vm1682_vm2, %v1965_v32, %v1966_v26  ;;  %v1999_v60 = vadd.f32 %v1966_v26, %v1927_v36  ;;  %v2040_v47 = vsel %vm2016_vm7, %v2038_v22, %v2039_v37 }
 0x1df   : > { %v2120_v41 = vmax.f32 %v2118_v28, %v2119_v45  ;;  %v2124_v2 = vmax.f32 %v2122_v29, %v2123_v35  ;;  %v1998_v16 = vadd.f32 %v1967_v31, %v1926_v46  ;;  %v1401_v49 = vpop.f32.mrb[64].mxu0  ;;  %v2209_v0 = vsel %vm2208_vm6, %v2207_v56, %v2206_v7 }
 0x1e0   : > { %v2072_v43 = vadd.f32 %v2039_v37, %v1999_v60  ;;  %v1403_v21 = vpop.f32.mrb[65].mxu0  ;;  %v2399_v62 = vrot.slane %v1401_v49, 1 }
 0x1e1   : > { %v2147_v55 = vadd.f32 %v4338_v34, %v2120_v41  ;;  %v2125_v58 = vrot.slane %v2124_v2, 2  ;;  %v2071_v61 = vadd.f32 %v2040_v47, %v1998_v16  ;;  %v1405_v33 = vpop.f32.mrb[66].mxu0  ;;  %v1514_v11 = vpop.f32.mrb[64].mxu1  ;;  %v2471_v63 = vrot.slane %v1403_v21, 2 }
 0x1e2   : > { %v2129_v59 = vsel %vm2016_vm7, %v2072_v43, -inf  ;;  %v2400_v3 = vrot.slane %v1405_v33, 1  ;;  %v2543_v4 = vrot.slane %v1514_v11, 3  ;;  %v1407_v53 = vpop.f32.mrb[67].mxu0  ;;  %v1516_v8 = vpop.f32.mrb[65].mxu1 }
 0x1e3   : > { %v2155_v9 = vmax.f32 %v2147_v55, 0.0  ;;  %v2126_v12 = vmax.f32 %v2124_v2, %v2125_v58  ;;  %v2130_v7 = vmax.f32 %v2071_v61, %v2129_v59  ;;  %v2472_v13 = vrot.slane %v1407_v53, 2  ;;  %v1518_v14 = vpop.f32.mrb[66].mxu1 }
 0x1e4   : > { %v2401_v57 = vsel %vm1609_vm1, %v2399_v62, %v2400_v3  ;;  %v2440_v15 = vadd.f32 %v2400_v3, %v4304_v24  ;;  %v2616_v17 = vrot.slane %v1516_v8, 4  ;;  %v2544_v22 = vrot.slane %v1518_v14, 3  ;;  %v1520_v30 = vpop.f32.mrb[67].mxu1 }
 0x1e5   : > { %v2210_v25 = vrot.slane %v2155_v9, 3  ;;  %v2127_v28 = vrot.slane %v2126_v12, 1  ;;  %v2131_v29 = vrot.slane %v2130_v7, 4  ;;  %v2439_v26 = vadd.f32 %v2401_v57, %v4301_v10 }
 0x1e6   : > { %v2473_v18 = vsel %vm1682_vm2, %v2471_v63, %v2472_v13  ;;  %v2512_v32 = vadd.f32 %v2472_v13, %v2440_v15  ;;  %v2545_v20 = vsel %vm2016_vm7, %v2543_v4, %v2544_v22  ;;  %v2617_v36 = vrot.slane %v1520_v30, 4 }
 0x1e7   : > { %v2128_v37 = vmax.f32 %v2126_v12, %v2127_v28  ;;  %v2132_v56 = vmax.f32 %v2130_v7, %v2131_v29  ;;  %v2511_v45 = vadd.f32 %v2473_v18, %v2439_v26  ;;  %v1411_v35 = vpop.f32.mrb[68].mxu0  ;;  %v2212_v24 = vsel %vm2211_vm8, %v2210_v25, %v2209_v0 }
 0x1e8   : > { %v2584_v46 = vadd.f32 %v2544_v22, %v2512_v32  ;;  %v2618_v31 = vsel %vm2615_vm11, %v2616_v17, %v2617_v36  ;;  %v1413_v60 = vpop.f32.mrb[69].mxu0  ;;  %v2402_v2 = vrot.slane %v1411_v35, 1 }
 0x1e9   : > { %v2133_v47 = vrot.slane %v2132_v56, 2  ;;  %v2583_v41 = vadd.f32 %v2545_v20, %v2511_v45  ;;  %v2474_v10 = vrot.slane %v1413_v60, 2  ;;  %v1415_v16 = vpop.f32.mrb[70].mxu0  ;;  %v1524_v49 = vpop.f32.mrb[68].mxu1  ;;  %v2148_v62 = vadd.f32 %v4338_v34, %v2128_v37 }
 0x1ea   : > { %v2657_v43 = vadd.f32 %v2617_v36, %v2584_v46  ;;  %v2403_v21 = vrot.slane %v1415_v16, 1  ;;  %v2546_v55 = vrot.slane %v1524_v49, 3  ;;  %v1417_v58 = vpop.f32.mrb[71].mxu0  ;;  %v1526_v61 = vpop.f32.mrb[69].mxu1 }
 0x1eb   : > { %v2134_v33 = vmax.f32 %v2132_v56, %v2133_v47  ;;  %v2656_v11 = vadd.f32 %v2618_v31, %v2583_v41  ;;  %v2475_v0 = vrot.slane %v1417_v58, 2  ;;  %v2619_v59 = vrot.slane %v1526_v61, 4  ;;  %v1528_v63 = vpop.f32.mrb[70].mxu1 }
 0x1ec   : > { %v2672_v3 = vsel %vm2615_vm11, %v2657_v43, -inf  ;;  %v2404_v4 = vsel %vm1609_vm1, %v2402_v2, %v2403_v21  ;;  %v2442_v53 = vadd.f32 %v2403_v21, %v4317_v6  ;;  %v2547_v8 = vrot.slane %v1528_v63, 3  ;;  %v1530_v9 = vpop.f32.mrb[71].mxu1 }
 0x1ed   : > { %v2135_v12 = vrot.slane %v2134_v33, 1  ;;  %v2673_v7 = vmax.f32 %v2656_v11, %v2672_v3  ;;  %v2441_v13 = vadd.f32 %v2404_v4, %v4312_v54  ;;  %v2476_v14 = vsel %vm1682_vm2, %v2474_v10, %v2475_v0 }
 0x1ee   : > { %v2514_v57 = vadd.f32 %v2475_v0, %v2442_v53  ;;  %v2548_v15 = vsel %vm2016_vm7, %v2546_v55, %v2547_v8  ;;  %v2620_v17 = vrot.slane %v1530_v9, 4  ;;  %v2156_v22 = vmax.f32 %v2148_v62, 0.0 }
 0x1ef   : > { %v2136_v30 = vmax.f32 %v2134_v33, %v2135_v12  ;;  %v2674_v25 = vrot.slane %v2673_v7, 4  ;;  %v2513_v28 = vadd.f32 %v2476_v14, %v2441_v13  ;;  %v1421_v29 = vpop.f32.mrb[72].mxu0 }
 0x1f0   : > { %v2586_v26 = vadd.f32 %v2547_v8, %v2514_v57  ;;  %v2621_v6 = vsel %vm2615_vm11, %v2619_v59, %v2620_v17  ;;  %v2405_v18 = vrot.slane %v1421_v29, 1  ;;  %v1423_v32 = vpop.f32.mrb[73].mxu0  ;;  %v2213_v20 = vrot.slane %v2156_v22, 2  ;;  %v3234_v29 = vld [vmem:[#allocation7 + $0x80] sm:$0xff]  }
 0x1f1   : > { %v2675_v36 = vmax.f32 %v2673_v7, %v2674_v25  ;;  %v2585_v37 = vadd.f32 %v2548_v15, %v2513_v28  ;;  %v2477_v54 = vrot.slane %v1423_v32, 2  ;;  %v1425_v56 = vpop.f32.mrb[74].mxu0  ;;  %v1534_v45 = vpop.f32.mrb[72].mxu1  ;;  %v2149_v35 = vadd.f32 %v4338_v34, %v2136_v30 }
 0x1f2   : > { %v2659_v46 = vadd.f32 %v2620_v17, %v2586_v26  ;;  %v2406_v31 = vrot.slane %v1425_v56, 1  ;;  %v2549_v60 = vrot.slane %v1534_v45, 3  ;;  %v1427_v47 = vpop.f32.mrb[75].mxu0  ;;  %v1536_v41 = vpop.f32.mrb[73].mxu1  ;;  %v2215_v2 = vsel %vm2214_vm9, %v2213_v20, %v2212_v24 }
 0x1f3   : > { %v2676_v10 = vrot.slane %v2675_v36, 2  ;;  %v2658_v16 = vadd.f32 %v2621_v6, %v2585_v37  ;;  %v2478_v49 = vrot.slane %v1427_v47, 2  ;;  %v2622_v43 = vrot.slane %v1536_v41, 4  ;;  %v1538_v21 = vpop.f32.mrb[74].mxu1 }
 0x1f4   : > { %v2680_v55 = vsel %vm2615_vm11, %v2659_v46, -inf  ;;  %v2407_v58 = vsel %vm1609_vm1, %v2405_v18, %v2406_v31  ;;  %v2444_v61 = vadd.f32 %v2406_v31, %v4329_v50  ;;  %v2550_v62 = vrot.slane %v1538_v21, 3  ;;  %v1540_v34 = vpop.f32.mrb[75].mxu1  ;;  %v4427_v50 = vld [vmem:[%s4550_s2 + $0x2] ss:$0 sm:$0xff] }
 0x1f5   : > { %v2677_v33 = vmax.f32 %v2675_v36, %v2676_v10  ;;  %v2681_v11 = vmax.f32 %v2658_v16, %v2680_v55  ;;  %v2443_v0 = vadd.f32 %v2407_v58, %v4325_v42  ;;  %v2479_v59 = vsel %vm1682_vm2, %v2477_v54, %v2478_v49 }
 0x1f6   : > { %v2516_v24 = vadd.f32 %v2478_v49, %v2444_v61  ;;  %v2551_v63 = vsel %vm2016_vm7, %v2549_v60, %v2550_v62  ;;  %v2623_v3 = vrot.slane %v1540_v34, 4  ;;  %v2157_v4 = vmax.f32 %v2149_v35, 0.0  ;;  %v3235_v49 = vld [vmem:[#allocation7 + $0x88] sm:$0xff]  }
 0x1f7   : > { %v2678_v53 = vrot.slane %v2677_v33, 1  ;;  %v2682_v8 = vrot.slane %v2681_v11, 4  ;;  %v2515_v9 = vadd.f32 %v2479_v59, %v2443_v0  ;;  %v1431_v12 = vpop.f32.mrb[76].mxu0 }
 0x1f8   : > { %v2588_v7 = vadd.f32 %v2550_v62, %v2516_v24  ;;  %v2624_v13 = vsel %vm2615_vm11, %v2622_v43, %v2623_v3  ;;  %v2408_v42 = vrot.slane %v1431_v12, 1  ;;  %v1433_v14 = vpop.f32.mrb[77].mxu0  ;;  %v2216_v57 = vrot.slane %v2157_v4, 1 }
 0x1f9   : > { %v2679_v15 = vmax.f32 %v2677_v33, %v2678_v53  ;;  %v2683_v17 = vmax.f32 %v2681_v11, %v2682_v8  ;;  %v2587_v22 = vadd.f32 %v2551_v63, %v2515_v9  ;;  %v2480_v30 = vrot.slane %v1433_v14, 2  ;;  %v1435_v25 = vpop.f32.mrb[78].mxu0  ;;  %v1544_v28 = vpop.f32.mrb[76].mxu1  ;;  %v3236_v8 = vld [vmem:[#allocation7 + $0x90] sm:$0xff]  }
 0x1fa   : > { %v2661_v26 = vadd.f32 %v2623_v3, %v2588_v7  ;;  %v2218_v6 = vsel %vm2217_vm10, %v2216_v57, %v2215_v2  ;;  %v2409_v18 = vrot.slane %v1435_v25, 1  ;;  %v2552_v32 = vrot.slane %v1544_v28, 3  ;;  %v1437_v20 = vpop.f32.mrb[79].mxu0  ;;  %v1546_v36 = vpop.f32.mrb[77].mxu1 }
 0x1fb   : > { %v4432_v37 = vadd.f32 %v4427_v50, %v2679_v15  ;;  %v2684_v54 = vrot.slane %v2683_v17, 2  ;;  %v2660_v56 = vadd.f32 %v2624_v13, %v2587_v22  ;;  %3326 = vmatmul.mubr.f32.vlgmr.msra.gmra.mrb[96].mxu0 %v2218_v6  ;;  %v2481_v45 = vrot.slane %v1437_v20, 2  ;;  %v1548_v35 = vpop.f32.mrb[78].mxu1 }
 0x1fc   : > { %v2688_v46 = vsel %vm2615_vm11, %v2661_v26, -inf  ;;  %v2410_v31 = vsel %vm1609_vm1, %v2408_v42, %v2409_v18  ;;  %v2446_v60 = vadd.f32 %v2409_v18, %v4346_v38  ;;  %v2625_v47 = vrot.slane %v1546_v36, 4  ;;  %v1550_v41 = vpop.f32.mrb[79].mxu1  ;;  %3448 = vmatpush3.bf16.msra.mxu0 %v3234_v29  ;;  %3395 = vmatprep.mubr.msk.f32.mxu0 %vm3864_vm0, %v3865_v51 }
 0x1fd   : > { %v2685_v2 = vmax.f32 %v2683_v17, %v2684_v54  ;;  %v2689_v10 = vmax.f32 %v2660_v56, %v2688_v46  ;;  %v2445_v16 = vadd.f32 %v2410_v31, %v4341_v23  ;;  %3449 = vmatprep.subr.bf16.mxu0 %v3863_v44  ;;  %v2482_v43 = vsel %vm1682_vm2, %v2480_v30, %v2481_v45  ;;  %v3237_v54 = vld [vmem:[#allocation7 + $0x98] sm:$0xff]  }
 0x1fe   : > { %v2518_v21 = vadd.f32 %v2481_v45, %v2446_v60  ;;  %v2553_v55 = vrot.slane %v1548_v35, 3  ;;  %v2626_v58 = vrot.slane %v1550_v41, 4  ;;  %v2749_v33 = vmax.f32 %v4432_v37, 0.0 }
 0x1ff   : > { %v2686_v61 = vrot.slane %v2685_v2, 1  ;;  %v2690_v38 = vrot.slane %v2689_v10, 4  ;;  %v2517_v62 = vadd.f32 %v2482_v43, %v2445_v16  ;;  %v1441_v34 = vpop.f32.mrb[80].mxu0 }
 0x200   : > { %v2554_v51 = vsel %vm2016_vm7, %v2552_v32, %v2553_v55  ;;  %v2590_v11 = vadd.f32 %v2553_v55, %v2518_v21  ;;  %v2627_v0 = vsel %vm2615_vm11, %v2625_v47, %v2626_v58  ;;  %v1443_v23 = vpop.f32.mrb[81].mxu0  ;;  %3451 = vmatpush3.bf16.msra.mxu0 %v3235_v49  ;;  %v2411_v3 = vrot.slane %v1441_v34, 1 }
 0x201   : > { %v2687_v59 = vmax.f32 %v2685_v2, %v2686_v61  ;;  %v2691_v24 = vmax.f32 %v2689_v10, %v2690_v38  ;;  %v2589_v63 = vadd.f32 %v2554_v51, %v2517_v62  ;;  %v1445_v4 = vpop.f32.mrb[82].mxu0  ;;  %v1554_v53 = vpop.f32.mrb[80].mxu1  ;;  %3452 = vmatprep.subr.bf16.mxu0 %v3863_v44  ;;  %v2483_v12 = vrot.slane %v1443_v23, 2  ;;  %v3238_v62 = vld [vmem:[#allocation7 + $0xa0] sm:$0xff]  }
 0x202   : > { %v2663_v9 = vadd.f32 %v2626_v58, %v2590_v11  ;;  %v2412_v7 = vrot.slane %v1445_v4, 1  ;;  %v2555_v13 = vrot.slane %v1554_v53, 3  ;;  %v1447_v42 = vpop.f32.mrb[83].mxu0  ;;  %v1556_v14 = vpop.f32.mrb[81].mxu1 }
 0x203   : > { %v2742_v57 = vadd.f32 %v4427_v50, %v2687_v59  ;;  %v2692_v15 = vrot.slane %v2691_v24, 2  ;;  %v2662_v17 = vadd.f32 %v2627_v0, %v2589_v63  ;;  %v2484_v22 = vrot.slane %v1447_v42, 2  ;;  %v1558_v30 = vpop.f32.mrb[82].mxu1 }
 0x204   : > { %v2696_v25 = vsel %vm2615_vm11, %v2663_v9, -inf  ;;  %v2413_v28 = vsel %vm1609_vm1, %v2411_v3, %v2412_v7  ;;  %v2448_v29 = vadd.f32 %v2412_v7, %v4357_v19  ;;  %v2628_v26 = vrot.slane %v1556_v14, 4  ;;  %v1560_v6 = vpop.f32.mrb[83].mxu1  ;;  %3454 = vmatpush3.bf16.msra.mxu0 %v3236_v8 }
 0x205   : > { %v2750_v18 = vmax.f32 %v2742_v57, 0.0  ;;  %v2693_v32 = vmax.f32 %v2691_v24, %v2692_v15  ;;  %v2697_v20 = vmax.f32 %v2662_v17, %v2696_v25  ;;  %v2447_v36 = vadd.f32 %v2413_v28, %v4353_v5  ;;  %3455 = vmatprep.subr.bf16.mxu0 %v3863_v44  ;;  %v3239_v57 = vld [vmem:[#allocation7 + $0xa8] sm:$0xff]  }
 0x206   : > { %v2485_v56 = vsel %vm1682_vm2, %v2483_v12, %v2484_v22  ;;  %v2520_v45 = vadd.f32 %v2484_v22, %v2448_v29  ;;  %v2556_v35 = vrot.slane %v1558_v30, 3  ;;  %v2629_v46 = vrot.slane %v1560_v6, 4 }
 0x207   : > { %v2797_v31 = vrot.slane %v2750_v18, 7  ;;  %v2694_v60 = vrot.slane %v2693_v32, 1  ;;  %v2698_v47 = vrot.slane %v2697_v20, 4  ;;  %v2519_v19 = vadd.f32 %v2485_v56, %v2447_v36  ;;  %v1451_v41 = vpop.f32.mrb[84].mxu0 }
 0x208   : > { %v2557_v2 = vsel %vm2016_vm7, %v2555_v13, %v2556_v35  ;;  %v2592_v10 = vadd.f32 %v2556_v35, %v2520_v45  ;;  %v2630_v16 = vsel %vm2615_vm11, %v2628_v26, %v2629_v46  ;;  %v2414_v49 = vrot.slane %v1451_v41, 1  ;;  %v1453_v5 = vpop.f32.mrb[85].mxu0  ;;  %3457 = vmatpush3.bf16.msra.mxu0 %v3237_v54 }
 0x209   : > { %v2695_v43 = vmax.f32 %v2693_v32, %v2694_v60  ;;  %v2699_v21 = vmax.f32 %v2697_v20, %v2698_v47  ;;  %v2591_v55 = vadd.f32 %v2557_v2, %v2519_v19  ;;  %v2486_v58 = vrot.slane %v1453_v5, 2  ;;  %v1455_v61 = vpop.f32.mrb[86].mxu0  ;;  %v1564_v38 = vpop.f32.mrb[84].mxu1  ;;  %3458 = vmatprep.subr.bf16.mxu0 %v3863_v44 }
 0x20a   : > { %v2665_v34 = vadd.f32 %v2629_v46, %v2592_v10  ;;  %v2415_v51 = vrot.slane %v1455_v61, 1  ;;  %v2558_v11 = vrot.slane %v1564_v38, 3  ;;  %v1457_v0 = vpop.f32.mrb[87].mxu0  ;;  %v1566_v23 = vpop.f32.mrb[85].mxu1  ;;  %v2798_v59 = vsel %vm2199_vm3, %v2797_v31, %v2749_v33  ;;  %v3240_v31 = vld [vmem:[#allocation7 + $0xb0] sm:$0xff]  }
 0x20b   : > { %v2743_v24 = vadd.f32 %v4427_v50, %v2695_v43  ;;  %v2700_v63 = vrot.slane %v2699_v21, 2  ;;  %v2664_v3 = vadd.f32 %v2630_v16, %v2591_v55  ;;  %v2487_v4 = vrot.slane %v1457_v0, 2  ;;  %v1568_v53 = vpop.f32.mrb[86].mxu1 }
 0x20c   : > { %v2704_v8 = vsel %vm2615_vm11, %v2665_v34, -inf  ;;  %v2416_v9 = vsel %vm1609_vm1, %v2414_v49, %v2415_v51  ;;  %v2450_v12 = vadd.f32 %v2415_v51, %v4369_v1  ;;  %v2631_v7 = vrot.slane %v1566_v23, 4  ;;  %v1570_v13 = vpop.f32.mrb[87].mxu1  ;;  %3460 = vmatpush3.bf16.msra.mxu0 %v3238_v62  ;;  %v3241_v23 = vld [vmem:[#allocation7 + $0xb8] sm:$0xff]  }
 0x20d   : > { %v2751_v42 = vmax.f32 %v2743_v24, 0.0  ;;  %v2701_v14 = vmax.f32 %v2699_v21, %v2700_v63  ;;  %v2705_v37 = vmax.f32 %v2664_v3, %v2704_v8  ;;  %v2449_v33 = vadd.f32 %v2416_v9, %v4365_v52  ;;  %3461 = vmatprep.subr.bf16.mxu0 %v3863_v44 }
 0x20e   : > { %v2488_v15 = vsel %vm1682_vm2, %v2486_v58, %v2487_v4  ;;  %v2522_v17 = vadd.f32 %v2487_v4, %v2450_v12  ;;  %v2559_v22 = vrot.slane %v1568_v53, 3  ;;  %v2632_v30 = vrot.slane %v1570_v13, 4 }
 0x20f   : > { %v2799_v25 = vrot.slane %v2751_v42, 6  ;;  %v2702_v28 = vrot.slane %v2701_v14, 1  ;;  %v2706_v29 = vrot.slane %v2705_v37, 4  ;;  %v2521_v1 = vadd.f32 %v2488_v15, %v2449_v33  ;;  %v1461_v26 = vpop.f32.mrb[88].mxu0 }
 0x210   : > { %v2560_v6 = vsel %vm2016_vm7, %v2558_v11, %v2559_v22  ;;  %v2594_v18 = vadd.f32 %v2559_v22, %v2522_v17  ;;  %v2633_v32 = vsel %vm2615_vm11, %v2631_v7, %v2632_v30  ;;  %v2417_v20 = vrot.slane %v1461_v26, 1  ;;  %v1463_v52 = vpop.f32.mrb[89].mxu0  ;;  %3463 = vmatpush3.bf16.msra.mxu0 %v3239_v57 }
 0x211   : > { %v2703_v36 = vmax.f32 %v2701_v14, %v2702_v28  ;;  %v2707_v54 = vmax.f32 %v2705_v37, %v2706_v29  ;;  %v2593_v56 = vadd.f32 %v2560_v6, %v2521_v1  ;;  %v2489_v45 = vrot.slane %v1463_v52, 2  ;;  %v1465_v35 = vpop.f32.mrb[90].mxu0  ;;  %v1574_v46 = vpop.f32.mrb[88].mxu1  ;;  %3464 = vmatprep.subr.bf16.mxu0 %v3863_v44 }
 0x212   : > { %v2667_v60 = vadd.f32 %v2632_v30, %v2594_v18  ;;  %v2418_v47 = vrot.slane %v1465_v35, 1  ;;  %v2561_v19 = vrot.slane %v1574_v46, 3  ;;  %v1467_v41 = vpop.f32.mrb[91].mxu0  ;;  %v1576_v2 = vpop.f32.mrb[89].mxu1  ;;  %v2800_v10 = vsel %vm2202_vm4, %v2799_v25, %v2798_v59 }
 0x213   : > { %v2744_v16 = vadd.f32 %v4427_v50, %v2703_v36  ;;  %v2708_v49 = vrot.slane %v2707_v54, 2  ;;  %v2666_v5 = vadd.f32 %v2633_v32, %v2593_v56  ;;  %v2490_v43 = vrot.slane %v1467_v41, 2  ;;  %v1578_v21 = vpop.f32.mrb[90].mxu1 }
 0x214   : > { %v2712_v55 = vsel %vm2615_vm11, %v2667_v60, -inf  ;;  %v2419_v58 = vsel %vm1609_vm1, %v2417_v20, %v2418_v47  ;;  %v2452_v61 = vadd.f32 %v2418_v47, %v4381_v48  ;;  %v2634_v38 = vrot.slane %v1576_v2, 4  ;;  %v1580_v62 = vpop.f32.mrb[91].mxu1  ;;  %3466 = vmatpush3.bf16.msra.mxu0 %v3240_v31 }
 0x215   : > { %v2752_v34 = vmax.f32 %v2744_v16, 0.0  ;;  %v2709_v51 = vmax.f32 %v2707_v54, %v2708_v49  ;;  %v2713_v11 = vmax.f32 %v2666_v5, %v2712_v55  ;;  %v2451_v0 = vadd.f32 %v2419_v58, %v4377_v40  ;;  %3467 = vmatprep.subr.bf16.mxu0 %v3863_v44 }
 0x216   : > { %v2491_v59 = vsel %vm1682_vm2, %v2489_v45, %v2490_v43  ;;  %v2524_v24 = vadd.f32 %v2490_v43, %v2452_v61  ;;  %v2562_v63 = vrot.slane %v1578_v21, 3  ;;  %v2635_v3 = vrot.slane %v1580_v62, 4 }
 0x217   : > { %v2801_v4 = vrot.slane %v2752_v34, 5  ;;  %v2710_v53 = vrot.slane %v2709_v51, 1  ;;  %v2714_v8 = vrot.slane %v2713_v11, 4  ;;  %v2523_v48 = vadd.f32 %v2491_v59, %v2451_v0  ;;  %v1471_v9 = vpop.f32.mrb[92].mxu0 }
 0x218   : > { %v2563_v12 = vsel %vm2016_vm7, %v2561_v19, %v2562_v63  ;;  %v2596_v7 = vadd.f32 %v2562_v63, %v2524_v24  ;;  %v2636_v13 = vsel %vm2615_vm11, %v2634_v38, %v2635_v3  ;;  %v2420_v42 = vrot.slane %v1471_v9, 1  ;;  %v1473_v40 = vpop.f32.mrb[93].mxu0  ;;  %3469 = vmatpush3.bf16.msra.mxu0 %v3241_v23 }
 0x219   : > { %v2711_v44 = vmax.f32 %v2709_v51, %v2710_v53  ;;  %v2715_v14 = vmax.f32 %v2713_v11, %v2714_v8  ;;  %v2595_v37 = vadd.f32 %v2563_v12, %v2523_v48  ;;  %v2492_v33 = vrot.slane %v1473_v40, 2  ;;  %v1475_v57 = vpop.f32.mrb[94].mxu0  ;;  %v1584_v15 = vpop.f32.mrb[92].mxu1 }
 0x21a   : > { %v2669_v17 = vadd.f32 %v2635_v3, %v2596_v7  ;;  %v2421_v22 = vrot.slane %v1475_v57, 1  ;;  %v2564_v30 = vrot.slane %v1584_v15, 3  ;;  %v1477_v25 = vpop.f32.mrb[95].mxu0  ;;  %v1586_v28 = vpop.f32.mrb[93].mxu1  ;;  %v2802_v29 = vsel %vm2205_vm5, %v2801_v4, %v2800_v10 }
 0x21b   : > { %v2745_v1 = vadd.f32 %v4427_v50, %v2711_v44  ;;  %v2716_v26 = vrot.slane %v2715_v14, 2  ;;  %v2668_v6 = vadd.f32 %v2636_v13, %v2595_v37  ;;  %v2493_v18 = vrot.slane %v1477_v25, 2  ;;  %v1588_v32 = vpop.f32.mrb[94].mxu1 }
 0x21c   : > { %v2720_v20 = vsel %vm2615_vm11, %v2669_v17, -inf  ;;  %v2422_v52 = vsel %vm1609_vm1, %v2420_v42, %v2421_v22  ;;  %v2454_v36 = vadd.f32 %v2421_v22, %v4393_v39  ;;  %v2637_v54 = vrot.slane %v1586_v28, 4  ;;  %v1590_v56 = vpop.f32.mrb[95].mxu1  ;;  %v3116_v28 = vld [vmem:[%s4552_s4] ss:$0 sm:$0xff] }
 0x21d   : > { %v2753_v45 = vmax.f32 %v2745_v1, 0.0  ;;  %v2717_v35 = vmax.f32 %v2715_v14, %v2716_v26  ;;  %v2721_v46 = vmax.f32 %v2668_v6, %v2720_v20  ;;  %v2453_v31 = vadd.f32 %v2422_v52, %v4389_v27 }
 0x21e   : > { %v2494_v60 = vsel %vm1682_vm2, %v2492_v33, %v2493_v18  ;;  %v2526_v47 = vadd.f32 %v2493_v18, %v2454_v36  ;;  %v2565_v19 = vrot.slane %v1588_v32, 3  ;;  %v2638_v41 = vrot.slane %v1590_v56, 4 }
 0x21f   : > { %v2803_v2 = vrot.slane %v2753_v45, 4  ;;  %v2718_v10 = vrot.slane %v2717_v35, 1  ;;  %v2722_v16 = vrot.slane %v2721_v46, 4  ;;  %v2525_v49 = vadd.f32 %v2494_v60, %v2453_v31 }
 0x220   : > { %v2566_v5 = vsel %vm2016_vm7, %v2564_v30, %v2565_v19  ;;  %v2598_v43 = vadd.f32 %v2565_v19, %v2526_v47  ;;  %v2639_v39 = vsel %vm2615_vm11, %v2637_v54, %v2638_v41 }
 0x221   : > { %v2719_v21 = vmax.f32 %v2717_v35, %v2718_v10  ;;  %v2723_v55 = vmax.f32 %v2721_v46, %v2722_v16  ;;  %v2597_v58 = vadd.f32 %v2566_v5, %v2525_v49  ;;  %v2804_v61 = vsel %vm2208_vm6, %v2803_v2, %v2802_v29 }
 0x222   : > { %v2671_v27 = vadd.f32 %v2638_v41, %v2598_v43 }
 0x223   : > { %v2724_v38 = vrot.slane %v2723_v55, 2  ;;  %v2670_v62 = vadd.f32 %v2639_v39, %v2597_v58  ;;  %v2746_v34 = vadd.f32 %v4427_v50, %v2719_v21 }
 0x224   : > { %v2728_v51 = vsel %vm2615_vm11, %v2671_v27, -inf }
 0x225   : > { %v2725_v11 = vmax.f32 %v2723_v55, %v2724_v38  ;;  %v2729_v0 = vmax.f32 %v2670_v62, %v2728_v51  ;;  %v2754_v23 = vmax.f32 %v2746_v34, 0.0 }
 0x227   : > { %v2726_v59 = vrot.slane %v2725_v11, 1  ;;  %v2730_v24 = vrot.slane %v2729_v0, 4  ;;  %v2805_v63 = vrot.slane %v2754_v23, 3 }
 0x229   : > { %v2727_v3 = vmax.f32 %v2725_v11, %v2726_v59  ;;  %v2731_v4 = vmax.f32 %v2729_v0, %v2730_v24  ;;  %v2806_v53 = vsel %vm2211_vm8, %v2805_v63, %v2804_v61 }
 0x22b   : > { %v2732_v8 = vrot.slane %v2731_v4, 2  ;;  %v2747_v48 = vadd.f32 %v4427_v50, %v2727_v3 }
 0x22d   : > { %v2733_v9 = vmax.f32 %v2731_v4, %v2732_v8  ;;  %v2755_v12 = vmax.f32 %v2747_v48, 0.0 }
 0x22f   : > { %v2734_v7 = vrot.slane %v2733_v9, 1  ;;  %v2807_v13 = vrot.slane %v2755_v12, 2 }
 0x231   : > { %v2735_v42 = vmax.f32 %v2733_v9, %v2734_v7  ;;  %v2808_v40 = vsel %vm2214_vm9, %v2807_v13, %v2806_v53 }
 0x233   : > { %v2748_v44 = vadd.f32 %v4427_v50, %v2735_v42 }
 0x235   : > { %v2756_v14 = vmax.f32 %v2748_v44, 0.0 }
 0x237   : > { %v2809_v37 = vrot.slane %v2756_v14, 1 }
 0x239   : > { %v2810_v33 = vsel %vm2217_vm10, %v2809_v37, %v2808_v40 }
 0x23a   : > { %3396 = vmatmul.mubr.f32.vlgmr.msra.gmra.mrb[98].mxu0 %v2810_v33 }
 0x28b   : > { %v2379_v57 = vpop.f32.mrb[96].mxu1 }
 0x28c   : > { %v3362_v15 = vpop.f32.mrb[97].mxu1 }
 0x2ce   : > { %v2286_v17 = vpop.f32.mrb[96].mxu0 }
 0x2cf   : > { %v2380_v22 = vadd.f32 %v2379_v57, %v2286_v17  ;;  %v3327_v30 = vpop.f32.mrb[97].mxu0 }
 0x30d   : > { %v2878_v25 = vpop.f32.mrb[98].mxu0 }
 0x30e   : > { %v2882_v50 = vadd.f32 %v2878_v25, %v2380_v22  ;;  %v3397_v29 = vpop.f32.mrb[99].mxu0 }
 0x310   : > { %v2890_v1 = vadd.f32 %v3116_v28, %v2882_v50 }
 0x312   : > { %2891 = vst [vmem:[%s272_s23] sm:$0xff] %v2890_v1 }
 0x313   : > { %3796 = shalt.err (!%p3793_p2)
}
 0x314   : > { %s3797_s17 = scalar_lea.hbm %s4504_s9, 128  ;;  %s3801_s14 = scalar_lea.hbm %s4553_s5, 256 }
 0x315   : > { %p3798_p13 = scmp.ne.s32.totalorder %s4504_s9, %s3797_s17  ;;  %p3802_p4 = scmp.lt.u32.totalorder %s4504_s9, %s4553_s5 }
 0x316   : > { %p3803_p7 = scmp.lt.u32.totalorder %s3801_s14, %s3797_s17  ;;  %p3805_p11 = scmp.lt.u32.totalorder %s3797_s17, %s4504_s9 }
 0x317   : > { %p3799_p6 = pnand %p3798_p13, %p4567_p0 }
 0x318   : > { %p3804_p8 = por %p3803_p7, %p3802_p4 }
 0x319   : > { %p3800_p10 = pneg %p3799_p6 }
 0x31a   : > { %p3806_p1 = por %p3805_p11, %p3804_p8 }
 0x31c   : > { %p3807_p3 = pnand %p3806_p1, %p3800_p10 }
 0x31e   : > { %3810 = shalt.err (!%p3807_p3)
}
 0x31f   : > { %3480 = dma.vmem_to_hbm [thread:$0]  (%p4567_p0), %s4506_s7, 128, %s4504_s9, %s2893_s24  }
 0x320 PF: > { %s2918_s11 = sand.u32 1, %s3841_s18   ;;  %p4568_p5 = scmp.ne.s32.totalorder %s4558_s25, 0 }
 0x321   : > { %p4569_p9 = scmp.ge.s32.totalorder %s3853_s21, 2  ;;  %s2919_s23 = scalar_lea.sflag [#allocation4], %s2918_s11 }
 0x323   : > { %p3494_p12 = pnand %p4569_p9, %p4568_p5 }
 0x325   : > { %3836 = dma.done.wait (!%p3494_p12), %s2919_s23, 128  }
 0x326   : > { %3838 = vsyncadd (!%p3494_p12), %s2919_s23, 4294967168  ;;  %p19_p2 = scmp.ge.s32.totalorder %s4010_s16, 4   ;;  %s4570_s18 = smov %s3845_s19 }
 0x327   : > { %s4571_s19 = smov %s3849_s20  ;;  %s4572_s20 = smov %s4019_s27 }
 0x328   : > { %s4573_s21 = smov %s4010_s16  ;;  %21 = sbr.rel (!%p19_p2) target bundleno = 6 (0x6), region = 93 }
 0x32f   :  { %2924 = vsyncpa [#allocation3], 1 }
 0x330   :  { %2926 = vsyncpa [#allocation3 + $0x1], 1 }
 0x331   :  { %2927 = vsyncpa [#allocation6], 1 }
 0x332   :  { %2928 = vsyncpa [#allocation4], 1 }
 0x333   :  { %2930 = vsyncpa [#allocation4 + $0x1], 1 }

</bundles_post_ra>
